<compile_context>
chip_gen: v7x
topology: tpu7x:2x2x1
jax: 0.10.0
libtpu: 0.0.40
codegen_flags: <defaults>
</compile_context>

<pallas_src>
import functools

import jax
import jax.numpy as jnp
from jax.experimental import pallas as pl
from jax.experimental.pallas import tpu as pltpu


def make_sohlstm_kernel(num_layers, hidden_size, seq_len, batch_pad, input_size):
    H = hidden_size
    T = seq_len
    Bp = batch_pad
    L = num_layers

    def kernel(x_ref, w_ih0_ref, b0_ref, w_rec_ref, *rest):
        out_ref = rest[-1]                                   # (Bp, 1)
        b_refs = rest[:L - 1]                                # biases for layers 1..L-1
        fc_w1_ref, fc_b1_ref, fc_w2_ref, fc_b2_ref = rest[L - 1:L + 3]

        # Hoisted layer-0 input projection (+ folded bias): one MXU GEMM over all
        # T*Bp rows, entirely off the serial recurrence chain.
        gates_x0 = (
            jnp.dot(x_ref[...], w_ih0_ref[...], preferred_element_type=jnp.float32)
            + b0_ref[...]
        )  # (T*Bp, 4H)

        # Fused recurrent weight: read once, slice per wavefront phase (each distinct
        # slice is materialized exactly once at trace time).
        w_rec = w_rec_ref[...]                               # (L*H, L*4H)
        rhs_cache = {}

        def rhs_slice(lhs_lo, lo, hi):
            key = (lhs_lo, lo, hi)
            if key not in rhs_cache:
                rhs_cache[key] = w_rec[lhs_lo * H:(hi + 1) * H,
                                       lo * 4 * H:(hi + 1) * 4 * H]
            return rhs_cache[key]

        h = [jnp.zeros((Bp, H), jnp.float32) for _ in range(L)]
        c = [jnp.zeros((Bp, H), jnp.float32) for _ in range(L)]

        # Layer/time wavefront: diagonal step d covers layer l at timestep t = d - l.
        for d in range(T + L - 1):
            lo = max(0, d - T + 1)          # lowest active layer
            hi = min(d, L - 1)              # highest active layer
            lhs_lo = lo - 1 if lo > 0 else 0  # include the finished layer below for its h

            lhs_parts = [h[l] for l in range(lhs_lo, hi + 1)]
            lhs = (lhs_parts[0] if len(lhs_parts) == 1
                   else jnp.concatenate(lhs_parts, axis=1))  # (Bp, n*H)

            # One MXU matmul covers every active layer's recurrent + inter-layer projection.
            fused = jnp.dot(lhs, rhs_slice(lhs_lo, lo, hi),
                            preferred_element_type=jnp.float32)  # (Bp, (hi-lo+1)*4H)

            new_h = {}
            new_c = {}
            for l in range(lo, hi + 1):
                t_l = d - l
                j = l - lo
                g = fused[:, j * 4 * H:(j + 1) * 4 * H]          # (Bp, 4H)
                if l == 0:
                    g = g + gates_x0[t_l * Bp:(t_l + 1) * Bp, :]
                else:
                    g = g + b_refs[l - 1][...]
                # Full-slab activations over the whole gate block, then slice per gate.
                # PyTorch gate order: i, f, g, o.
                sig = jax.nn.sigmoid(g)
                tnh = jnp.tanh(g)
                i_g = sig[:, 0 * H:1 * H]
                f_g = sig[:, 1 * H:2 * H]
                g_g = tnh[:, 2 * H:3 * H]
                o_g = sig[:, 3 * H:4 * H]
                c_n = f_g * c[l] + i_g * g_g
                new_c[l] = c_n
                new_h[l] = o_g * jnp.tanh(c_n)
            for l in range(lo, hi + 1):
                h[l] = new_h[l]
                c[l] = new_c[l]

        h_last = h[L - 1]  # top-layer hidden at the last timestep, (Bp, H)

        # FC head: Linear -> LeakyReLU(0.01) -> (Dropout = identity) -> Linear.
        hid = (jnp.dot(h_last, fc_w1_ref[...], preferred_element_type=jnp.float32)
               + fc_b1_ref[...])
        hid = jnp.where(hid > 0, hid, 0.01 * hid)
        # Final (H/2 -> 1) projection as VPU multiply + lane reduction (no 1-lane MXU pass).
        out_ref[...] = (jnp.sum(hid * fc_w2_ref[...], axis=1, keepdims=True)
                        + fc_b2_ref[...])                     # (Bp, 1)

    return kernel


def init_sohlstm_params(key, input_size, hidden_size, num_layers):
    """Deterministic init mirroring PyTorch's uniform(-1/sqrt(fan), 1/sqrt(fan))."""
    H = hidden_size
    params = {}
    k_lstm = 1.0 / jnp.sqrt(jnp.float32(H))
    for l in range(num_layers):
        in_l = input_size if l == 0 else H
        key, k1, k2, k3, k4 = jax.random.split(key, 5)
        # Stored pre-transposed: kernel does x @ W.
        params[f"w_ih_{l}"] = jax.random.uniform(k1, (in_l, 4 * H), jnp.float32, -k_lstm, k_lstm)
        params[f"w_hh_{l}"] = jax.random.uniform(k2, (H, 4 * H), jnp.float32, -k_lstm, k_lstm)
        b_ih = jax.random.uniform(k3, (4 * H,), jnp.float32, -k_lstm, k_lstm)
        b_hh = jax.random.uniform(k4, (4 * H,), jnp.float32, -k_lstm, k_lstm)
        params[f"b_{l}"] = (b_ih + b_hh).reshape(1, 4 * H)

    half = H // 2
    key, k1, k2, k3, k4 = jax.random.split(key, 5)
    k_fc1 = 1.0 / jnp.sqrt(jnp.float32(H))
    k_fc2 = 1.0 / jnp.sqrt(jnp.float32(half))
    params["fc_w1"] = jax.random.uniform(k1, (H, half), jnp.float32, -k_fc1, k_fc1)
    params["fc_b1"] = jax.random.uniform(k2, (half,), jnp.float32, -k_fc1, k_fc1).reshape(1, half)
    params["fc_w2"] = jax.random.uniform(k3, (half, 1), jnp.float32, -k_fc2, k_fc2)
    params["fc_b2"] = jax.random.uniform(k4, (1,), jnp.float32, -k_fc2, k_fc2).reshape(1, 1)
    return params


def _build_fused_recurrent_weight(params, num_layers, hidden_size):
    """Upper-bidiagonal fused weight: (l,l)=W_hh_l, (l,l+1)=W_ih_{l+1}, else 0."""
    H = hidden_size
    L = num_layers
    zero = jnp.zeros((H, 4 * H), jnp.float32)
    rows = []
    for r in range(L):
        row = []
        for col in range(L):
            if col == r:
                row.append(params[f"w_hh_{r}"])
            elif col == r + 1:
                row.append(params[f"w_ih_{col}"])
            else:
                row.append(zero)
        rows.append(jnp.concatenate(row, axis=1))
    return jnp.concatenate(rows, axis=0)  # (L*H, L*4H)


@functools.partial(jax.jit, static_argnames=("num_layers", "hidden_size"))
def sohlstm_forward(x, params, *, num_layers, hidden_size):
    """x: (B, T, I) batch-first (PyTorch convention). Returns (B,)."""
    B, T, I = x.shape
    H = hidden_size
    L = num_layers
    Bp = max(8, ((B + 7) // 8) * 8)  # pad batch to the 8-sublane width

    # Time-major, batch-padded, flattened to (T*Bp, I) for the hoisted layer-0 projection.
    x_tm = jnp.transpose(x, (1, 0, 2))                        # (T, B, I)
    x_tm = jnp.pad(x_tm, ((0, 0), (0, Bp - B), (0, 0)))       # (T, Bp, I)
    x_flat = x_tm.reshape(T * Bp, I)                          # (T*Bp, I)

    w_rec = _build_fused_recurrent_weight(params, L, H)       # (L*H, L*4H)

    flat_inputs = [x_flat, params["w_ih_0"], params["b_0"], w_rec]
    flat_inputs += [params[f"b_{l}"] for l in range(1, L)]
    flat_inputs += [params["fc_w1"], params["fc_b1"],
                    params["fc_w2"].reshape(1, H // 2), params["fc_b2"]]

    # Advisory cost estimate for XLA scheduling around the custom call.
    LH = L * H
    flops = 2 * T * Bp * I * 4 * H                            # hoisted layer-0 projection
    flops += (T + L - 1) * 2 * Bp * LH * 4 * LH               # wavefront recurrent matmuls
    flops += 2 * Bp * H * (H // 2) + 2 * Bp * (H // 2)        # FC head
    transcendentals = 9 * H * Bp * T * L                      # 2 gate slabs + tanh(c) per cell
    param_elems = sum(int(a.size) for a in flat_inputs[1:])
    bytes_accessed = 4 * (T * Bp * I + param_elems + Bp)
    cost = pl.CostEstimate(flops=flops, transcendentals=transcendentals,
                           bytes_accessed=bytes_accessed)

    kernel = make_sohlstm_kernel(L, H, T, Bp, I)
    out = pl.pallas_call(
        kernel,
        out_shape=jax.ShapeDtypeStruct((Bp, 1), jnp.float32),
        in_specs=[pl.BlockSpec(memory_space=pltpu.MemorySpace.VMEM)] * len(flat_inputs),
        out_specs=pl.BlockSpec(memory_space=pltpu.MemorySpace.VMEM),
        cost_estimate=cost,
    )(*flat_inputs)
    return out[:B, 0]


def _lstm_cell_ref(x_t, h, c, w_ih, w_hh, b, H):
    gates = x_t @ w_ih + h @ w_hh + b
    i = jax.nn.sigmoid(gates[:, 0 * H:1 * H])
    f = jax.nn.sigmoid(gates[:, 1 * H:2 * H])
    g = jnp.tanh(gates[:, 2 * H:3 * H])
    o = jax.nn.sigmoid(gates[:, 3 * H:4 * H])
    c_new = f * c + i * g
    h_new = o * jnp.tanh(c_new)
    return h_new, c_new


def sohlstm_forward_ref(x, params, *, num_layers, hidden_size):
    """Pure-JAX reference (same math) for a correctness check."""
    B, T, _ = x.shape
    H = hidden_size
    layer_in = x
    for l in range(num_layers):
        w_ih = params[f"w_ih_{l}"]
        w_hh = params[f"w_hh_{l}"]
        b = params[f"b_{l}"]
        h = jnp.zeros((B, H), jnp.float32)
        c = jnp.zeros((B, H), jnp.float32)
        outs = []
        for t in range(T):
            h, c = _lstm_cell_ref(layer_in[:, t, :], h, c, w_ih, w_hh, b, H)
            outs.append(h)
        layer_in = jnp.stack(outs, axis=1)
    h_last = layer_in[:, -1, :]
    hid = h_last @ params["fc_w1"] + params["fc_b1"]
    hid = jnp.where(hid > 0, hid, 0.01 * hid)
    out = hid @ params["fc_w2"] + params["fc_b2"]
    return out[:, 0]


if __name__ == "__main__":
    INPUT_SIZE = 4
    HIDDEN_SIZE = 32
    NUM_LAYERS = 2
    BATCH = 2
    SEQ = 8

    key = jax.random.PRNGKey(0)
    key_x, key_p = jax.random.split(key)
    x = jax.random.normal(key_x, (BATCH, SEQ, INPUT_SIZE), jnp.float32)
    params = init_sohlstm_params(key_p, INPUT_SIZE, HIDDEN_SIZE, NUM_LAYERS)

    y = sohlstm_forward(x, params, num_layers=NUM_LAYERS, hidden_size=HIDDEN_SIZE)
    y = jax.block_until_ready(y)

    y_ref = sohlstm_forward_ref(x, params, num_layers=NUM_LAYERS, hidden_size=HIDDEN_SIZE)
    assert y.shape == (BATCH,)
    assert jnp.allclose(y, y_ref, atol=1e-4, rtol=1e-4), (y, y_ref)

    print("KERNEL_OK")
</pallas_src>

<mosaic_0001>
module attributes {stable_mosaic.version = 11 : i64} {
  func.func @kernel(%arg0: memref<64x4xf32, #tpu.memory_space<vmem>>, %arg1: memref<4x128xf32, #tpu.memory_space<vmem>>, %arg2: memref<1x128xf32, #tpu.memory_space<vmem>>, %arg3: memref<64x256xf32, #tpu.memory_space<vmem>>, %arg4: memref<1x128xf32, #tpu.memory_space<vmem>>, %arg5: memref<32x16xf32, #tpu.memory_space<vmem>>, %arg6: memref<1x16xf32, #tpu.memory_space<vmem>>, %arg7: memref<1x16xf32, #tpu.memory_space<vmem>>, %arg8: memref<1x1xf32, #tpu.memory_space<vmem>>, %arg9: memref<8x1xf32, #tpu.memory_space<vmem>>) attributes {dimension_semantics = [], scalar_prefetch = 0 : i64, scratch_operands = 0 : i64, tpu.core_type = #tpu.core_type<tc>} {
    %c0 = arith.constant 0 : index
    %c0_0 = arith.constant 0 : index
    %0 = vector.load %arg0[%c0, %c0_0] : memref<64x4xf32, #tpu.memory_space<vmem>>, vector<64x4xf32>
    %c0_1 = arith.constant 0 : index
    %c0_2 = arith.constant 0 : index
    %1 = vector.load %arg1[%c0_1, %c0_2] : memref<4x128xf32, #tpu.memory_space<vmem>>, vector<4x128xf32>
    %cst = arith.constant dense<0.000000e+00> : vector<64x128xf32>
    %2 = tpu.matmul %0, %1, %cst {dimension_numbers = #tpu.dot_dimension_numbers<[1], [0], [0], [1], [0, 0, 1, 1], [], []>} : vector<64x4xf32>, vector<4x128xf32>, vector<64x128xf32> -> vector<64x128xf32>
    %c0_3 = arith.constant 0 : index
    %c0_4 = arith.constant 0 : index
    %3 = vector.load %arg2[%c0_3, %c0_4] : memref<1x128xf32, #tpu.memory_space<vmem>>, vector<1x128xf32>
    %4 = vector.broadcast %3 : vector<1x128xf32> to vector<64x128xf32>
    %5 = arith.addf %2, %4 : vector<64x128xf32>
    %c0_5 = arith.constant 0 : index
    %c0_6 = arith.constant 0 : index
    %6 = vector.load %arg3[%c0_5, %c0_6] : memref<64x256xf32, #tpu.memory_space<vmem>>, vector<64x256xf32>
    %cst_7 = arith.constant 0.000000e+00 : f32
    %7 = vector.broadcast %cst_7 : f32 to vector<8x32xf32>
    %cst_8 = arith.constant 0.000000e+00 : f32
    %8 = vector.broadcast %cst_8 : f32 to vector<8x32xf32>
    %cst_9 = arith.constant 0.000000e+00 : f32
    %9 = vector.broadcast %cst_9 : f32 to vector<8x32xf32>
    %cst_10 = arith.constant 0.000000e+00 : f32
    %10 = vector.broadcast %cst_10 : f32 to vector<8x32xf32>
    %11 = vector.extract_strided_slice %6 {offsets = [0, 0], sizes = [32, 128], strides = [1, 1]} : vector<64x256xf32> to vector<32x128xf32>
    %cst_11 = arith.constant dense<0.000000e+00> : vector<8x128xf32>
    %12 = tpu.matmul %7, %11, %cst_11 {dimension_numbers = #tpu.dot_dimension_numbers<[1], [0], [0], [1], [0, 0, 1, 1], [], []>} : vector<8x32xf32>, vector<32x128xf32>, vector<8x128xf32> -> vector<8x128xf32>
    %13 = vector.extract_strided_slice %5 {offsets = [0, 0], sizes = [8, 128], strides = [1, 1]} : vector<64x128xf32> to vector<8x128xf32>
    %14 = arith.addf %12, %13 : vector<8x128xf32>
    %15 = arith.negf %14 : vector<8x128xf32>
    %16 = math.exp %15 : vector<8x128xf32>
    %cst_12 = arith.constant 1.000000e+00 : f32
    %17 = vector.broadcast %cst_12 : f32 to vector<8x128xf32>
    %18 = arith.addf %17, %16 : vector<8x128xf32>
    %19 = arith.divf %17, %18 : vector<8x128xf32>
    %20 = math.tanh %14 : vector<8x128xf32>
    %21 = vector.extract_strided_slice %19 {offsets = [0, 0], sizes = [8, 32], strides = [1, 1]} : vector<8x128xf32> to vector<8x32xf32>
    %22 = vector.extract_strided_slice %19 {offsets = [0, 32], sizes = [8, 32], strides = [1, 1]} : vector<8x128xf32> to vector<8x32xf32>
    %23 = vector.extract_strided_slice %20 {offsets = [0, 64], sizes = [8, 32], strides = [1, 1]} : vector<8x128xf32> to vector<8x32xf32>
    %24 = vector.extract_strided_slice %19 {offsets = [0, 96], sizes = [8, 32], strides = [1, 1]} : vector<8x128xf32> to vector<8x32xf32>
    %25 = arith.mulf %22, %9 : vector<8x32xf32>
    %26 = arith.mulf %21, %23 : vector<8x32xf32>
    %27 = arith.addf %25, %26 : vector<8x32xf32>
    %28 = math.tanh %27 : vector<8x32xf32>
    %29 = arith.mulf %24, %28 : vector<8x32xf32>
    %30 = tpu.concatenate %29, %8 in 1 : vector<8x32xf32>, vector<8x32xf32> -> vector<8x64xf32>
    %cst_13 = arith.constant dense<0.000000e+00> : vector<8x256xf32>
    %31 = tpu.matmul %30, %6, %cst_13 {dimension_numbers = #tpu.dot_dimension_numbers<[1], [0], [0], [1], [0, 0, 1, 1], [], []>} : vector<8x64xf32>, vector<64x256xf32>, vector<8x256xf32> -> vector<8x256xf32>
    %32 = vector.extract_strided_slice %31 {offsets = [0, 0], sizes = [8, 128], strides = [1, 1]} : vector<8x256xf32> to vector<8x128xf32>
    %33 = vector.extract_strided_slice %5 {offsets = [8, 0], sizes = [8, 128], strides = [1, 1]} : vector<64x128xf32> to vector<8x128xf32>
    %34 = arith.addf %32, %33 : vector<8x128xf32>
    %35 = arith.negf %34 : vector<8x128xf32>
    %36 = math.exp %35 : vector<8x128xf32>
    %cst_14 = arith.constant 1.000000e+00 : f32
    %37 = vector.broadcast %cst_14 : f32 to vector<8x128xf32>
    %38 = arith.addf %37, %36 : vector<8x128xf32>
    %39 = arith.divf %37, %38 : vector<8x128xf32>
    %40 = math.tanh %34 : vector<8x128xf32>
    %41 = vector.extract_strided_slice %39 {offsets = [0, 0], sizes = [8, 32], strides = [1, 1]} : vector<8x128xf32> to vector<8x32xf32>
    %42 = vector.extract_strided_slice %39 {offsets = [0, 32], sizes = [8, 32], strides = [1, 1]} : vector<8x128xf32> to vector<8x32xf32>
    %43 = vector.extract_strided_slice %40 {offsets = [0, 64], sizes = [8, 32], strides = [1, 1]} : vector<8x128xf32> to vector<8x32xf32>
    %44 = vector.extract_strided_slice %39 {offsets = [0, 96], sizes = [8, 32], strides = [1, 1]} : vector<8x128xf32> to vector<8x32xf32>
    %45 = arith.mulf %42, %27 : vector<8x32xf32>
    %46 = arith.mulf %41, %43 : vector<8x32xf32>
    %47 = arith.addf %45, %46 : vector<8x32xf32>
    %48 = math.tanh %47 : vector<8x32xf32>
    %49 = arith.mulf %44, %48 : vector<8x32xf32>
    %50 = vector.extract_strided_slice %31 {offsets = [0, 128], sizes = [8, 128], strides = [1, 1]} : vector<8x256xf32> to vector<8x128xf32>
    %c0_15 = arith.constant 0 : index
    %c0_16 = arith.constant 0 : index
    %51 = vector.load %arg4[%c0_15, %c0_16] : memref<1x128xf32, #tpu.memory_space<vmem>>, vector<1x128xf32>
    %52 = vector.broadcast %51 : vector<1x128xf32> to vector<8x128xf32>
    %53 = arith.addf %50, %52 : vector<8x128xf32>
    %54 = arith.negf %53 : vector<8x128xf32>
    %55 = math.exp %54 : vector<8x128xf32>
    %cst_17 = arith.constant 1.000000e+00 : f32
    %56 = vector.broadcast %cst_17 : f32 to vector<8x128xf32>
    %57 = arith.addf %56, %55 : vector<8x128xf32>
    %58 = arith.divf %56, %57 : vector<8x128xf32>
    %59 = math.tanh %53 : vector<8x128xf32>
    %60 = vector.extract_strided_slice %58 {offsets = [0, 0], sizes = [8, 32], strides = [1, 1]} : vector<8x128xf32> to vector<8x32xf32>
    %61 = vector.extract_strided_slice %58 {offsets = [0, 32], sizes = [8, 32], strides = [1, 1]} : vector<8x128xf32> to vector<8x32xf32>
    %62 = vector.extract_strided_slice %59 {offsets = [0, 64], sizes = [8, 32], strides = [1, 1]} : vector<8x128xf32> to vector<8x32xf32>
    %63 = vector.extract_strided_slice %58 {offsets = [0, 96], sizes = [8, 32], strides = [1, 1]} : vector<8x128xf32> to vector<8x32xf32>
    %64 = arith.mulf %61, %10 : vector<8x32xf32>
    %65 = arith.mulf %60, %62 : vector<8x32xf32>
    %66 = arith.addf %64, %65 : vector<8x32xf32>
    %67 = math.tanh %66 : vector<8x32xf32>
    %68 = arith.mulf %63, %67 : vector<8x32xf32>
    %69 = tpu.concatenate %49, %68 in 1 : vector<8x32xf32>, vector<8x32xf32> -> vector<8x64xf32>
    %cst_18 = arith.constant dense<0.000000e+00> : vector<8x256xf32>
    %70 = tpu.matmul %69, %6, %cst_18 {dimension_numbers = #tpu.dot_dimension_numbers<[1], [0], [0], [1], [0, 0, 1, 1], [], []>} : vector<8x64xf32>, vector<64x256xf32>, vector<8x256xf32> -> vector<8x256xf32>
    %71 = vector.extract_strided_slice %70 {offsets = [0, 0], sizes = [8, 128], strides = [1, 1]} : vector<8x256xf32> to vector<8x128xf32>
    %72 = vector.extract_strided_slice %5 {offsets = [16, 0], sizes = [8, 128], strides = [1, 1]} : vector<64x128xf32> to vector<8x128xf32>
    %73 = arith.addf %71, %72 : vector<8x128xf32>
    %74 = arith.negf %73 : vector<8x128xf32>
    %75 = math.exp %74 : vector<8x128xf32>
    %cst_19 = arith.constant 1.000000e+00 : f32
    %76 = vector.broadcast %cst_19 : f32 to vector<8x128xf32>
    %77 = arith.addf %76, %75 : vector<8x128xf32>
    %78 = arith.divf %76, %77 : vector<8x128xf32>
    %79 = math.tanh %73 : vector<8x128xf32>
    %80 = vector.extract_strided_slice %78 {offsets = [0, 0], sizes = [8, 32], strides = [1, 1]} : vector<8x128xf32> to vector<8x32xf32>
    %81 = vector.extract_strided_slice %78 {offsets = [0, 32], sizes = [8, 32], strides = [1, 1]} : vector<8x128xf32> to vector<8x32xf32>
    %82 = vector.extract_strided_slice %79 {offsets = [0, 64], sizes = [8, 32], strides = [1, 1]} : vector<8x128xf32> to vector<8x32xf32>
    %83 = vector.extract_strided_slice %78 {offsets = [0, 96], sizes = [8, 32], strides = [1, 1]} : vector<8x128xf32> to vector<8x32xf32>
    %84 = arith.mulf %81, %47 : vector<8x32xf32>
    %85 = arith.mulf %80, %82 : vector<8x32xf32>
    %86 = arith.addf %84, %85 : vector<8x32xf32>
    %87 = math.tanh %86 : vector<8x32xf32>
    %88 = arith.mulf %83, %87 : vector<8x32xf32>
    %89 = vector.extract_strided_slice %70 {offsets = [0, 128], sizes = [8, 128], strides = [1, 1]} : vector<8x256xf32> to vector<8x128xf32>
    %c0_20 = arith.constant 0 : index
    %c0_21 = arith.constant 0 : index
    %90 = vector.load %arg4[%c0_20, %c0_21] : memref<1x128xf32, #tpu.memory_space<vmem>>, vector<1x128xf32>
    %91 = vector.broadcast %90 : vector<1x128xf32> to vector<8x128xf32>
    %92 = arith.addf %89, %91 : vector<8x128xf32>
    %93 = arith.negf %92 : vector<8x128xf32>
    %94 = math.exp %93 : vector<8x128xf32>
    %cst_22 = arith.constant 1.000000e+00 : f32
    %95 = vector.broadcast %cst_22 : f32 to vector<8x128xf32>
    %96 = arith.addf %95, %94 : vector<8x128xf32>
    %97 = arith.divf %95, %96 : vector<8x128xf32>
    %98 = math.tanh %92 : vector<8x128xf32>
    %99 = vector.extract_strided_slice %97 {offsets = [0, 0], sizes = [8, 32], strides = [1, 1]} : vector<8x128xf32> to vector<8x32xf32>
    %100 = vector.extract_strided_slice %97 {offsets = [0, 32], sizes = [8, 32], strides = [1, 1]} : vector<8x128xf32> to vector<8x32xf32>
    %101 = vector.extract_strided_slice %98 {offsets = [0, 64], sizes = [8, 32], strides = [1, 1]} : vector<8x128xf32> to vector<8x32xf32>
    %102 = vector.extract_strided_slice %97 {offsets = [0, 96], sizes = [8, 32], strides = [1, 1]} : vector<8x128xf32> to vector<8x32xf32>
    %103 = arith.mulf %100, %66 : vector<8x32xf32>
    %104 = arith.mulf %99, %101 : vector<8x32xf32>
    %105 = arith.addf %103, %104 : vector<8x32xf32>
    %106 = math.tanh %105 : vector<8x32xf32>
    %107 = arith.mulf %102, %106 : vector<8x32xf32>
    %108 = tpu.concatenate %88, %107 in 1 : vector<8x32xf32>, vector<8x32xf32> -> vector<8x64xf32>
    %cst_23 = arith.constant dense<0.000000e+00> : vector<8x256xf32>
    %109 = tpu.matmul %108, %6, %cst_23 {dimension_numbers = #tpu.dot_dimension_numbers<[1], [0], [0], [1], [0, 0, 1, 1], [], []>} : vector<8x64xf32>, vector<64x256xf32>, vector<8x256xf32> -> vector<8x256xf32>
    %110 = vector.extract_strided_slice %109 {offsets = [0, 0], sizes = [8, 128], strides = [1, 1]} : vector<8x256xf32> to vector<8x128xf32>
    %111 = vector.extract_strided_slice %5 {offsets = [24, 0], sizes = [8, 128], strides = [1, 1]} : vector<64x128xf32> to vector<8x128xf32>
    %112 = arith.addf %110, %111 : vector<8x128xf32>
    %113 = arith.negf %112 : vector<8x128xf32>
    %114 = math.exp %113 : vector<8x128xf32>
    %cst_24 = arith.constant 1.000000e+00 : f32
    %115 = vector.broadcast %cst_24 : f32 to vector<8x128xf32>
    %116 = arith.addf %115, %114 : vector<8x128xf32>
    %117 = arith.divf %115, %116 : vector<8x128xf32>
    %118 = math.tanh %112 : vector<8x128xf32>
    %119 = vector.extract_strided_slice %117 {offsets = [0, 0], sizes = [8, 32], strides = [1, 1]} : vector<8x128xf32> to vector<8x32xf32>
    %120 = vector.extract_strided_slice %117 {offsets = [0, 32], sizes = [8, 32], strides = [1, 1]} : vector<8x128xf32> to vector<8x32xf32>
    %121 = vector.extract_strided_slice %118 {offsets = [0, 64], sizes = [8, 32], strides = [1, 1]} : vector<8x128xf32> to vector<8x32xf32>
    %122 = vector.extract_strided_slice %117 {offsets = [0, 96], sizes = [8, 32], strides = [1, 1]} : vector<8x128xf32> to vector<8x32xf32>
    %123 = arith.mulf %120, %86 : vector<8x32xf32>
    %124 = arith.mulf %119, %121 : vector<8x32xf32>
    %125 = arith.addf %123, %124 : vector<8x32xf32>
    %126 = math.tanh %125 : vector<8x32xf32>
    %127 = arith.mulf %122, %126 : vector<8x32xf32>
    %128 = vector.extract_strided_slice %109 {offsets = [0, 128], sizes = [8, 128], strides = [1, 1]} : vector<8x256xf32> to vector<8x128xf32>
    %c0_25 = arith.constant 0 : index
    %c0_26 = arith.constant 0 : index
    %129 = vector.load %arg4[%c0_25, %c0_26] : memref<1x128xf32, #tpu.memory_space<vmem>>, vector<1x128xf32>
    %130 = vector.broadcast %129 : vector<1x128xf32> to vector<8x128xf32>
    %131 = arith.addf %128, %130 : vector<8x128xf32>
    %132 = arith.negf %131 : vector<8x128xf32>
    %133 = math.exp %132 : vector<8x128xf32>
    %cst_27 = arith.constant 1.000000e+00 : f32
    %134 = vector.broadcast %cst_27 : f32 to vector<8x128xf32>
    %135 = arith.addf %134, %133 : vector<8x128xf32>
    %136 = arith.divf %134, %135 : vector<8x128xf32>
    %137 = math.tanh %131 : vector<8x128xf32>
    %138 = vector.extract_strided_slice %136 {offsets = [0, 0], sizes = [8, 32], strides = [1, 1]} : vector<8x128xf32> to vector<8x32xf32>
    %139 = vector.extract_strided_slice %136 {offsets = [0, 32], sizes = [8, 32], strides = [1, 1]} : vector<8x128xf32> to vector<8x32xf32>
    %140 = vector.extract_strided_slice %137 {offsets = [0, 64], sizes = [8, 32], strides = [1, 1]} : vector<8x128xf32> to vector<8x32xf32>
    %141 = vector.extract_strided_slice %136 {offsets = [0, 96], sizes = [8, 32], strides = [1, 1]} : vector<8x128xf32> to vector<8x32xf32>
    %142 = arith.mulf %139, %105 : vector<8x32xf32>
    %143 = arith.mulf %138, %140 : vector<8x32xf32>
    %144 = arith.addf %142, %143 : vector<8x32xf32>
    %145 = math.tanh %144 : vector<8x32xf32>
    %146 = arith.mulf %141, %145 : vector<8x32xf32>
    %147 = tpu.concatenate %127, %146 in 1 : vector<8x32xf32>, vector<8x32xf32> -> vector<8x64xf32>
    %cst_28 = arith.constant dense<0.000000e+00> : vector<8x256xf32>
    %148 = tpu.matmul %147, %6, %cst_28 {dimension_numbers = #tpu.dot_dimension_numbers<[1], [0], [0], [1], [0, 0, 1, 1], [], []>} : vector<8x64xf32>, vector<64x256xf32>, vector<8x256xf32> -> vector<8x256xf32>
    %149 = vector.extract_strided_slice %148 {offsets = [0, 0], sizes = [8, 128], strides = [1, 1]} : vector<8x256xf32> to vector<8x128xf32>
    %150 = vector.extract_strided_slice %5 {offsets = [32, 0], sizes = [8, 128], strides = [1, 1]} : vector<64x128xf32> to vector<8x128xf32>
    %151 = arith.addf %149, %150 : vector<8x128xf32>
    %152 = arith.negf %151 : vector<8x128xf32>
    %153 = math.exp %152 : vector<8x128xf32>
    %cst_29 = arith.constant 1.000000e+00 : f32
    %154 = vector.broadcast %cst_29 : f32 to vector<8x128xf32>
    %155 = arith.addf %154, %153 : vector<8x128xf32>
    %156 = arith.divf %154, %155 : vector<8x128xf32>
    %157 = math.tanh %151 : vector<8x128xf32>
    %158 = vector.extract_strided_slice %156 {offsets = [0, 0], sizes = [8, 32], strides = [1, 1]} : vector<8x128xf32> to vector<8x32xf32>
    %159 = vector.extract_strided_slice %156 {offsets = [0, 32], sizes = [8, 32], strides = [1, 1]} : vector<8x128xf32> to vector<8x32xf32>
    %160 = vector.extract_strided_slice %157 {offsets = [0, 64], sizes = [8, 32], strides = [1, 1]} : vector<8x128xf32> to vector<8x32xf32>
    %161 = vector.extract_strided_slice %156 {offsets = [0, 96], sizes = [8, 32], strides = [1, 1]} : vector<8x128xf32> to vector<8x32xf32>
    %162 = arith.mulf %159, %125 : vector<8x32xf32>
    %163 = arith.mulf %158, %160 : vector<8x32xf32>
    %164 = arith.addf %162, %163 : vector<8x32xf32>
    %165 = math.tanh %164 : vector<8x32xf32>
    %166 = arith.mulf %161, %165 : vector<8x32xf32>
    %167 = vector.extract_strided_slice %148 {offsets = [0, 128], sizes = [8, 128], strides = [1, 1]} : vector<8x256xf32> to vector<8x128xf32>
    %c0_30 = arith.constant 0 : index
    %c0_31 = arith.constant 0 : index
    %168 = vector.load %arg4[%c0_30, %c0_31] : memref<1x128xf32, #tpu.memory_space<vmem>>, vector<1x128xf32>
    %169 = vector.broadcast %168 : vector<1x128xf32> to vector<8x128xf32>
    %170 = arith.addf %167, %169 : vector<8x128xf32>
    %171 = arith.negf %170 : vector<8x128xf32>
    %172 = math.exp %171 : vector<8x128xf32>
    %cst_32 = arith.constant 1.000000e+00 : f32
    %173 = vector.broadcast %cst_32 : f32 to vector<8x128xf32>
    %174 = arith.addf %173, %172 : vector<8x128xf32>
    %175 = arith.divf %173, %174 : vector<8x128xf32>
    %176 = math.tanh %170 : vector<8x128xf32>
    %177 = vector.extract_strided_slice %175 {offsets = [0, 0], sizes = [8, 32], strides = [1, 1]} : vector<8x128xf32> to vector<8x32xf32>
    %178 = vector.extract_strided_slice %175 {offsets = [0, 32], sizes = [8, 32], strides = [1, 1]} : vector<8x128xf32> to vector<8x32xf32>
    %179 = vector.extract_strided_slice %176 {offsets = [0, 64], sizes = [8, 32], strides = [1, 1]} : vector<8x128xf32> to vector<8x32xf32>
    %180 = vector.extract_strided_slice %175 {offsets = [0, 96], sizes = [8, 32], strides = [1, 1]} : vector<8x128xf32> to vector<8x32xf32>
    %181 = arith.mulf %178, %144 : vector<8x32xf32>
    %182 = arith.mulf %177, %179 : vector<8x32xf32>
    %183 = arith.addf %181, %182 : vector<8x32xf32>
    %184 = math.tanh %183 : vector<8x32xf32>
    %185 = arith.mulf %180, %184 : vector<8x32xf32>
    %186 = tpu.concatenate %166, %185 in 1 : vector<8x32xf32>, vector<8x32xf32> -> vector<8x64xf32>
    %cst_33 = arith.constant dense<0.000000e+00> : vector<8x256xf32>
    %187 = tpu.matmul %186, %6, %cst_33 {dimension_numbers = #tpu.dot_dimension_numbers<[1], [0], [0], [1], [0, 0, 1, 1], [], []>} : vector<8x64xf32>, vector<64x256xf32>, vector<8x256xf32> -> vector<8x256xf32>
    %188 = vector.extract_strided_slice %187 {offsets = [0, 0], sizes = [8, 128], strides = [1, 1]} : vector<8x256xf32> to vector<8x128xf32>
    %189 = vector.extract_strided_slice %5 {offsets = [40, 0], sizes = [8, 128], strides = [1, 1]} : vector<64x128xf32> to vector<8x128xf32>
    %190 = arith.addf %188, %189 : vector<8x128xf32>
    %191 = arith.negf %190 : vector<8x128xf32>
    %192 = math.exp %191 : vector<8x128xf32>
    %cst_34 = arith.constant 1.000000e+00 : f32
    %193 = vector.broadcast %cst_34 : f32 to vector<8x128xf32>
    %194 = arith.addf %193, %192 : vector<8x128xf32>
    %195 = arith.divf %193, %194 : vector<8x128xf32>
    %196 = math.tanh %190 : vector<8x128xf32>
    %197 = vector.extract_strided_slice %195 {offsets = [0, 0], sizes = [8, 32], strides = [1, 1]} : vector<8x128xf32> to vector<8x32xf32>
    %198 = vector.extract_strided_slice %195 {offsets = [0, 32], sizes = [8, 32], strides = [1, 1]} : vector<8x128xf32> to vector<8x32xf32>
    %199 = vector.extract_strided_slice %196 {offsets = [0, 64], sizes = [8, 32], strides = [1, 1]} : vector<8x128xf32> to vector<8x32xf32>
    %200 = vector.extract_strided_slice %195 {offsets = [0, 96], sizes = [8, 32], strides = [1, 1]} : vector<8x128xf32> to vector<8x32xf32>
    %201 = arith.mulf %198, %164 : vector<8x32xf32>
    %202 = arith.mulf %197, %199 : vector<8x32xf32>
    %203 = arith.addf %201, %202 : vector<8x32xf32>
    %204 = math.tanh %203 : vector<8x32xf32>
    %205 = arith.mulf %200, %204 : vector<8x32xf32>
    %206 = vector.extract_strided_slice %187 {offsets = [0, 128], sizes = [8, 128], strides = [1, 1]} : vector<8x256xf32> to vector<8x128xf32>
    %c0_35 = arith.constant 0 : index
    %c0_36 = arith.constant 0 : index
    %207 = vector.load %arg4[%c0_35, %c0_36] : memref<1x128xf32, #tpu.memory_space<vmem>>, vector<1x128xf32>
    %208 = vector.broadcast %207 : vector<1x128xf32> to vector<8x128xf32>
    %209 = arith.addf %206, %208 : vector<8x128xf32>
    %210 = arith.negf %209 : vector<8x128xf32>
    %211 = math.exp %210 : vector<8x128xf32>
    %cst_37 = arith.constant 1.000000e+00 : f32
    %212 = vector.broadcast %cst_37 : f32 to vector<8x128xf32>
    %213 = arith.addf %212, %211 : vector<8x128xf32>
    %214 = arith.divf %212, %213 : vector<8x128xf32>
    %215 = math.tanh %209 : vector<8x128xf32>
    %216 = vector.extract_strided_slice %214 {offsets = [0, 0], sizes = [8, 32], strides = [1, 1]} : vector<8x128xf32> to vector<8x32xf32>
    %217 = vector.extract_strided_slice %214 {offsets = [0, 32], sizes = [8, 32], strides = [1, 1]} : vector<8x128xf32> to vector<8x32xf32>
    %218 = vector.extract_strided_slice %215 {offsets = [0, 64], sizes = [8, 32], strides = [1, 1]} : vector<8x128xf32> to vector<8x32xf32>
    %219 = vector.extract_strided_slice %214 {offsets = [0, 96], sizes = [8, 32], strides = [1, 1]} : vector<8x128xf32> to vector<8x32xf32>
    %220 = arith.mulf %217, %183 : vector<8x32xf32>
    %221 = arith.mulf %216, %218 : vector<8x32xf32>
    %222 = arith.addf %220, %221 : vector<8x32xf32>
    %223 = math.tanh %222 : vector<8x32xf32>
    %224 = arith.mulf %219, %223 : vector<8x32xf32>
    %225 = tpu.concatenate %205, %224 in 1 : vector<8x32xf32>, vector<8x32xf32> -> vector<8x64xf32>
    %cst_38 = arith.constant dense<0.000000e+00> : vector<8x256xf32>
    %226 = tpu.matmul %225, %6, %cst_38 {dimension_numbers = #tpu.dot_dimension_numbers<[1], [0], [0], [1], [0, 0, 1, 1], [], []>} : vector<8x64xf32>, vector<64x256xf32>, vector<8x256xf32> -> vector<8x256xf32>
    %227 = vector.extract_strided_slice %226 {offsets = [0, 0], sizes = [8, 128], strides = [1, 1]} : vector<8x256xf32> to vector<8x128xf32>
    %228 = vector.extract_strided_slice %5 {offsets = [48, 0], sizes = [8, 128], strides = [1, 1]} : vector<64x128xf32> to vector<8x128xf32>
    %229 = arith.addf %227, %228 : vector<8x128xf32>
    %230 = arith.negf %229 : vector<8x128xf32>
    %231 = math.exp %230 : vector<8x128xf32>
    %cst_39 = arith.constant 1.000000e+00 : f32
    %232 = vector.broadcast %cst_39 : f32 to vector<8x128xf32>
    %233 = arith.addf %232, %231 : vector<8x128xf32>
    %234 = arith.divf %232, %233 : vector<8x128xf32>
    %235 = math.tanh %229 : vector<8x128xf32>
    %236 = vector.extract_strided_slice %234 {offsets = [0, 0], sizes = [8, 32], strides = [1, 1]} : vector<8x128xf32> to vector<8x32xf32>
    %237 = vector.extract_strided_slice %234 {offsets = [0, 32], sizes = [8, 32], strides = [1, 1]} : vector<8x128xf32> to vector<8x32xf32>
    %238 = vector.extract_strided_slice %235 {offsets = [0, 64], sizes = [8, 32], strides = [1, 1]} : vector<8x128xf32> to vector<8x32xf32>
    %239 = vector.extract_strided_slice %234 {offsets = [0, 96], sizes = [8, 32], strides = [1, 1]} : vector<8x128xf32> to vector<8x32xf32>
    %240 = arith.mulf %237, %203 : vector<8x32xf32>
    %241 = arith.mulf %236, %238 : vector<8x32xf32>
    %242 = arith.addf %240, %241 : vector<8x32xf32>
    %243 = math.tanh %242 : vector<8x32xf32>
    %244 = arith.mulf %239, %243 : vector<8x32xf32>
    %245 = vector.extract_strided_slice %226 {offsets = [0, 128], sizes = [8, 128], strides = [1, 1]} : vector<8x256xf32> to vector<8x128xf32>
    %c0_40 = arith.constant 0 : index
    %c0_41 = arith.constant 0 : index
    %246 = vector.load %arg4[%c0_40, %c0_41] : memref<1x128xf32, #tpu.memory_space<vmem>>, vector<1x128xf32>
    %247 = vector.broadcast %246 : vector<1x128xf32> to vector<8x128xf32>
    %248 = arith.addf %245, %247 : vector<8x128xf32>
    %249 = arith.negf %248 : vector<8x128xf32>
    %250 = math.exp %249 : vector<8x128xf32>
    %cst_42 = arith.constant 1.000000e+00 : f32
    %251 = vector.broadcast %cst_42 : f32 to vector<8x128xf32>
    %252 = arith.addf %251, %250 : vector<8x128xf32>
    %253 = arith.divf %251, %252 : vector<8x128xf32>
    %254 = math.tanh %248 : vector<8x128xf32>
    %255 = vector.extract_strided_slice %253 {offsets = [0, 0], sizes = [8, 32], strides = [1, 1]} : vector<8x128xf32> to vector<8x32xf32>
    %256 = vector.extract_strided_slice %253 {offsets = [0, 32], sizes = [8, 32], strides = [1, 1]} : vector<8x128xf32> to vector<8x32xf32>
    %257 = vector.extract_strided_slice %254 {offsets = [0, 64], sizes = [8, 32], strides = [1, 1]} : vector<8x128xf32> to vector<8x32xf32>
    %258 = vector.extract_strided_slice %253 {offsets = [0, 96], sizes = [8, 32], strides = [1, 1]} : vector<8x128xf32> to vector<8x32xf32>
    %259 = arith.mulf %256, %222 : vector<8x32xf32>
    %260 = arith.mulf %255, %257 : vector<8x32xf32>
    %261 = arith.addf %259, %260 : vector<8x32xf32>
    %262 = math.tanh %261 : vector<8x32xf32>
    %263 = arith.mulf %258, %262 : vector<8x32xf32>
    %264 = tpu.concatenate %244, %263 in 1 : vector<8x32xf32>, vector<8x32xf32> -> vector<8x64xf32>
    %cst_43 = arith.constant dense<0.000000e+00> : vector<8x256xf32>
    %265 = tpu.matmul %264, %6, %cst_43 {dimension_numbers = #tpu.dot_dimension_numbers<[1], [0], [0], [1], [0, 0, 1, 1], [], []>} : vector<8x64xf32>, vector<64x256xf32>, vector<8x256xf32> -> vector<8x256xf32>
    %266 = vector.extract_strided_slice %265 {offsets = [0, 0], sizes = [8, 128], strides = [1, 1]} : vector<8x256xf32> to vector<8x128xf32>
    %267 = vector.extract_strided_slice %5 {offsets = [56, 0], sizes = [8, 128], strides = [1, 1]} : vector<64x128xf32> to vector<8x128xf32>
    %268 = arith.addf %266, %267 : vector<8x128xf32>
    %269 = arith.negf %268 : vector<8x128xf32>
    %270 = math.exp %269 : vector<8x128xf32>
    %cst_44 = arith.constant 1.000000e+00 : f32
    %271 = vector.broadcast %cst_44 : f32 to vector<8x128xf32>
    %272 = arith.addf %271, %270 : vector<8x128xf32>
    %273 = arith.divf %271, %272 : vector<8x128xf32>
    %274 = math.tanh %268 : vector<8x128xf32>
    %275 = vector.extract_strided_slice %273 {offsets = [0, 0], sizes = [8, 32], strides = [1, 1]} : vector<8x128xf32> to vector<8x32xf32>
    %276 = vector.extract_strided_slice %273 {offsets = [0, 32], sizes = [8, 32], strides = [1, 1]} : vector<8x128xf32> to vector<8x32xf32>
    %277 = vector.extract_strided_slice %274 {offsets = [0, 64], sizes = [8, 32], strides = [1, 1]} : vector<8x128xf32> to vector<8x32xf32>
    %278 = vector.extract_strided_slice %273 {offsets = [0, 96], sizes = [8, 32], strides = [1, 1]} : vector<8x128xf32> to vector<8x32xf32>
    %279 = arith.mulf %276, %242 : vector<8x32xf32>
    %280 = arith.mulf %275, %277 : vector<8x32xf32>
    %281 = arith.addf %279, %280 : vector<8x32xf32>
    %282 = math.tanh %281 : vector<8x32xf32>
    %283 = arith.mulf %278, %282 : vector<8x32xf32>
    %284 = vector.extract_strided_slice %265 {offsets = [0, 128], sizes = [8, 128], strides = [1, 1]} : vector<8x256xf32> to vector<8x128xf32>
    %c0_45 = arith.constant 0 : index
    %c0_46 = arith.constant 0 : index
    %285 = vector.load %arg4[%c0_45, %c0_46] : memref<1x128xf32, #tpu.memory_space<vmem>>, vector<1x128xf32>
    %286 = vector.broadcast %285 : vector<1x128xf32> to vector<8x128xf32>
    %287 = arith.addf %284, %286 : vector<8x128xf32>
    %288 = arith.negf %287 : vector<8x128xf32>
    %289 = math.exp %288 : vector<8x128xf32>
    %cst_47 = arith.constant 1.000000e+00 : f32
    %290 = vector.broadcast %cst_47 : f32 to vector<8x128xf32>
    %291 = arith.addf %290, %289 : vector<8x128xf32>
    %292 = arith.divf %290, %291 : vector<8x128xf32>
    %293 = math.tanh %287 : vector<8x128xf32>
    %294 = vector.extract_strided_slice %292 {offsets = [0, 0], sizes = [8, 32], strides = [1, 1]} : vector<8x128xf32> to vector<8x32xf32>
    %295 = vector.extract_strided_slice %292 {offsets = [0, 32], sizes = [8, 32], strides = [1, 1]} : vector<8x128xf32> to vector<8x32xf32>
    %296 = vector.extract_strided_slice %293 {offsets = [0, 64], sizes = [8, 32], strides = [1, 1]} : vector<8x128xf32> to vector<8x32xf32>
    %297 = vector.extract_strided_slice %292 {offsets = [0, 96], sizes = [8, 32], strides = [1, 1]} : vector<8x128xf32> to vector<8x32xf32>
    %298 = arith.mulf %295, %261 : vector<8x32xf32>
    %299 = arith.mulf %294, %296 : vector<8x32xf32>
    %300 = arith.addf %298, %299 : vector<8x32xf32>
    %301 = math.tanh %300 : vector<8x32xf32>
    %302 = arith.mulf %297, %301 : vector<8x32xf32>
    %303 = tpu.concatenate %283, %302 in 1 : vector<8x32xf32>, vector<8x32xf32> -> vector<8x64xf32>
    %304 = vector.extract_strided_slice %6 {offsets = [0, 128], sizes = [64, 128], strides = [1, 1]} : vector<64x256xf32> to vector<64x128xf32>
    %cst_48 = arith.constant dense<0.000000e+00> : vector<8x128xf32>
    %305 = tpu.matmul %303, %304, %cst_48 {dimension_numbers = #tpu.dot_dimension_numbers<[1], [0], [0], [1], [0, 0, 1, 1], [], []>} : vector<8x64xf32>, vector<64x128xf32>, vector<8x128xf32> -> vector<8x128xf32>
    %c0_49 = arith.constant 0 : index
    %c0_50 = arith.constant 0 : index
    %306 = vector.load %arg4[%c0_49, %c0_50] : memref<1x128xf32, #tpu.memory_space<vmem>>, vector<1x128xf32>
    %307 = vector.broadcast %306 : vector<1x128xf32> to vector<8x128xf32>
    %308 = arith.addf %305, %307 : vector<8x128xf32>
    %309 = arith.negf %308 : vector<8x128xf32>
    %310 = math.exp %309 : vector<8x128xf32>
    %cst_51 = arith.constant 1.000000e+00 : f32
    %311 = vector.broadcast %cst_51 : f32 to vector<8x128xf32>
    %312 = arith.addf %311, %310 : vector<8x128xf32>
    %313 = arith.divf %311, %312 : vector<8x128xf32>
    %314 = math.tanh %308 : vector<8x128xf32>
    %315 = vector.extract_strided_slice %313 {offsets = [0, 0], sizes = [8, 32], strides = [1, 1]} : vector<8x128xf32> to vector<8x32xf32>
    %316 = vector.extract_strided_slice %313 {offsets = [0, 32], sizes = [8, 32], strides = [1, 1]} : vector<8x128xf32> to vector<8x32xf32>
    %317 = vector.extract_strided_slice %314 {offsets = [0, 64], sizes = [8, 32], strides = [1, 1]} : vector<8x128xf32> to vector<8x32xf32>
    %318 = vector.extract_strided_slice %313 {offsets = [0, 96], sizes = [8, 32], strides = [1, 1]} : vector<8x128xf32> to vector<8x32xf32>
    %319 = arith.mulf %316, %300 : vector<8x32xf32>
    %320 = arith.mulf %315, %317 : vector<8x32xf32>
    %321 = arith.addf %319, %320 : vector<8x32xf32>
    %322 = math.tanh %321 : vector<8x32xf32>
    %323 = arith.mulf %318, %322 : vector<8x32xf32>
    %c0_52 = arith.constant 0 : index
    %c0_53 = arith.constant 0 : index
    %324 = vector.load %arg5[%c0_52, %c0_53] : memref<32x16xf32, #tpu.memory_space<vmem>>, vector<32x16xf32>
    %cst_54 = arith.constant dense<0.000000e+00> : vector<8x16xf32>
    %325 = tpu.matmul %323, %324, %cst_54 {dimension_numbers = #tpu.dot_dimension_numbers<[1], [0], [0], [1], [0, 0, 1, 1], [], []>} : vector<8x32xf32>, vector<32x16xf32>, vector<8x16xf32> -> vector<8x16xf32>
    %c0_55 = arith.constant 0 : index
    %c0_56 = arith.constant 0 : index
    %326 = vector.load %arg6[%c0_55, %c0_56] : memref<1x16xf32, #tpu.memory_space<vmem>>, vector<1x16xf32>
    %327 = vector.broadcast %326 : vector<1x16xf32> to vector<8x16xf32>
    %328 = arith.addf %325, %327 : vector<8x16xf32>
    %cst_57 = arith.constant 0.000000e+00 : f32
    %329 = vector.broadcast %cst_57 : f32 to vector<8x16xf32>
    %330 = arith.cmpf ogt, %328, %329 : vector<8x16xf32>
    %cst_58 = arith.constant 0.00999999977 : f32
    %331 = vector.broadcast %cst_58 : f32 to vector<8x16xf32>
    %332 = arith.mulf %331, %328 : vector<8x16xf32>
    %333 = arith.select %330, %328, %332 : vector<8x16xi1>, vector<8x16xf32>
    %c0_59 = arith.constant 0 : index
    %c0_60 = arith.constant 0 : index
    %334 = vector.load %arg7[%c0_59, %c0_60] : memref<1x16xf32, #tpu.memory_space<vmem>>, vector<1x16xf32>
    %335 = vector.broadcast %334 : vector<1x16xf32> to vector<8x16xf32>
    %336 = arith.mulf %333, %335 : vector<8x16xf32>
    %cst_61 = arith.constant dense<0.000000e+00> : vector<8xf32>
    %337 = vector.multi_reduction <add>, %336, %cst_61 [1] : vector<8x16xf32> to vector<8xf32>
    %338 = vector.shape_cast %337 : vector<8xf32> to vector<8x1xf32>
    %c0_62 = arith.constant 0 : index
    %c0_63 = arith.constant 0 : index
    %339 = vector.load %arg8[%c0_62, %c0_63] : memref<1x1xf32, #tpu.memory_space<vmem>>, vector<1x1xf32>
    %340 = vector.broadcast %339 : vector<1x1xf32> to vector<8x1xf32>
    %341 = arith.addf %338, %340 : vector<8x1xf32>
    %c0_64 = arith.constant 0 : index
    %c0_65 = arith.constant 0 : index
    %342 = vector.load %arg9[%c0_64, %c0_65] : memref<8x1xf32, #tpu.memory_space<vmem>>, vector<8x1xf32>
    tpu.vector_store %arg9[%c0_64, %c0_65], %341 {strides = array<i32>} : memref<8x1xf32, #tpu.memory_space<vmem>>, vector<8x1xf32>,
    return
  }
}

</mosaic_0001>

<bundles_post_ra>
// kernel: sohlstm_forward.1
= control target key start
LH: loop header
LB: loop body
LE: loop exit
PB: predicated region body
PF: predicated region fallthrough
CT: control target
= control target key end

     0   :  { %vm75_vm0 = vcmask 1043456   ;;  %vm50_vm1 = vcmask 31744   ;;  %v1845_v0 = vmov 0.0|0.0   ;;  %vm1846_vm2 = vmmov 0   ;;  %s1848_s24 = smov 64   ;;  %s2241_s3 = inlined_call_operand.vmem [shape: f32[64,256], index: 3, kind: input, shape index: {}]   ;;  %s2242_s1 = inlined_call_operand.vmem [shape: f32[4,128], index: 1, kind: input, shape index: {}]   ;;  %s2243_s0 = inlined_call_operand.vmem [shape: f32[64,4], index: 0, kind: input, shape index: {}]   ;;  %s2244_s2 = inlined_call_operand.vmem [shape: f32[1,128], index: 2, kind: input, shape index: {}]   ;;  %s2245_s4 = inlined_call_operand.vmem [shape: f32[1,128], index: 4, kind: input, shape index: {}]   ;;  %s2246_s5 = inlined_call_operand.vmem [shape: f32[32,16], index: 5, kind: input, shape index: {}]   ;;  %s2247_s8 = inlined_call_operand.<no memory space> [shape: f32[1,1], index: 8, kind: input, shape index: {}]   ;;  %s2248_s6 = inlined_call_operand.vmem [shape: f32[1,16], index: 6, kind: input, shape index: {}]   ;;  %s2249_s7 = inlined_call_operand.vmem [shape: f32[1,16], index: 7, kind: input, shape index: {}]   ;;  %s2250_s9 = inlined_call_operand.vmem [shape: f32[8,1], index: 9, kind: output, shape index: {}]  }
   0x1   :  { %1576 = vmatprep.subr.bf16.mxu1 %v1845_v0  ;;  %v184_v1 = vld [vmem:[%s2241_s3] sm:$0xff]  ;;  %v186_v2 = vld [vmem:[%s2241_s3 + $0x10] sm:$0xff]  ;;  %v35_v6 = vld [vmem:[%s2243_s0 + $0x8] sm:$0xff]  ;;  %v1847_v8 = vmov 0.0   ;;  %vm200_vm3 = vcmask 261120   ;;  %vm303_vm4 = vcmask 523264  }
   0x2   :  { %v42_v3 = vld [vmem:[%s2242_s1] sm:$0xf]  ;;  %v1910_v4 = vpack.c.bf16 %v186_v2, %v184_v1  ;;  %1543 = vmatprep.mubr.msk.f32.mxu1 %vm1846_vm2, %v1847_v8  ;;  %v190_v9 = vld [vmem:[%s2241_s3 + $0x30] sm:$0xff]  ;;  %v185_v28 = vld [vmem:[%s2241_s3 + $0x8] sm:$0xff]  ;;  %vm1436_vm6 = vcmask 130048   ;;  %vm1448_vm7 = vcmask 7168  }
   0x3   :  { %1521 = vmatprep.subr.msk.mxu0 %vm75_vm0, %v42_v3  ;;  %v34_v5 = vld [vmem:[%s2243_s0] sm:$0xff]  ;;  %v187_v29 = vld [vmem:[%s2241_s3 + $0x18] sm:$0xff]  ;;  %v36_v30 = vld [vmem:[%s2243_s0 + $0x10] sm:$0xff] }
   0x4   :  { %v188_v7 = vld [vmem:[%s2241_s3 + $0x20] sm:$0xff]  ;;  %1522 = vmatpush3.msk.msra.mxu0 %vm75_vm0, %v42_v3  ;;  %1523 = vmatprep.mubr.msk.f32.mxu0 %vm50_vm1, %v34_v5  ;;  %v1959_v31 = vpack.c.bf16 %v187_v29, %v185_v28  ;;  %v37_v32 = vld [vmem:[%s2243_s0 + $0x18] sm:$0xff]  ;;  %v189_v33 = vld [vmem:[%s2241_s3 + $0x28] sm:$0xff] }
   0x5   :  { %1578 = vmatpush3.bf16.msra.mxu1 %v1910_v4  ;;  %1524 = vmatmul.mubr.msk.f32.vlgmr.msra.gmra.mrb[0].mxu0 %vm50_vm1, %v35_v6  ;;  %v1931_v10 = vpack.c.bf16 %v190_v9, %v188_v7  ;;  %v1942_v12 = vld [vmem:[%s2244_s2] ss:$0 sm:$0xff]  ;;  %s1849_s2 = smov 32   ;;  %v191_v34 = vld [vmem:[%s2241_s3 + $0x38] sm:$0xff]  ;;  %v193_v37 = vld [vmem:[%s2241_s3 + $0x48] sm:$0xff] }
   0x6   :  { %1579 = vmatprep.subr.bf16.mxu1 %v1845_v0  ;;  %1526 = vmatprep.mubr.msk.f32.mxu0 %vm50_vm1, %v36_v30  ;;  %v1972_v35 = vpack.c.bf16 %v191_v34, %v189_v33  ;;  %v38_v36 = vld [vmem:[%s2243_s0 + $0x20] sm:$0xff]  ;;  %v39_v38 = vld [vmem:[%s2243_s0 + $0x28] sm:$0xff]  ;;  %v195_v39 = vld [vmem:[%s2241_s3 + $0x58] sm:$0xff] }
   0x7   :  { %1583 = vmatprep.subr.bf16.mxu0 %v1959_v31  ;;  %v40_v40 = vld [vmem:[%s2243_s0 + $0x30] sm:$0xff]  ;;  %v1994_v41 = vpack.c.bf16 %v195_v39, %v193_v37  ;;  %v192_v42 = vld [vmem:[%s2241_s3 + $0x40] sm:$0xff]  ;;  %v197_v44 = vld [vmem:[%s2241_s3 + $0x68] sm:$0xff] }
   0x8   :  { %1585 = vmatpush1.bf16.msra.mxu0 %v1910_v4  ;;  %v194_v43 = vld [vmem:[%s2241_s3 + $0x50] sm:$0xff]  ;;  %v199_v45 = vld [vmem:[%s2241_s3 + $0x78] sm:$0xff]  ;;  %v196_v49 = vld [vmem:[%s2241_s3 + $0x60] sm:$0xff] }
   0x9   :  { %1581 = vmatpush3.bf16.msra.mxu1 %v1931_v10  ;;  %1527 = vmatmul.mubr.msk.f32.gmra.mrb[2].mxu0 %vm50_vm1, %v37_v32  ;;  %v41_v46 = vld [vmem:[%s2243_s0 + $0x38] sm:$0xff]  ;;  %v2016_v47 = vpack.c.bf16 %v194_v43, %v192_v42  ;;  %v2019_v48 = vpack.c.bf16 %v199_v45, %v197_v44  ;;  %v198_v50 = vld [vmem:[%s2241_s3 + $0x70] sm:$0xff]  ;;  %v2071_v1 = vld [vmem:[%s2245_s4] ss:$0 sm:$0xff] }
   0xa   :  { %1529 = vmatprep.mubr.msk.f32.mxu0 %vm50_vm1, %v38_v36  ;;  %1599 = vmatprep.subr.bf16.mxu1 %v1959_v31  ;;  %v2033_v52 = vpack.c.bf16 %v198_v50, %v196_v49 }
   0xb   :  { %1587 = vmatprep.subr.bf16.mxu0 %v1972_v35 }
   0xc   :  { %1544 = vmatmul.mubr.f32.vlgmr.msra.gmra.mrb[0].mxu1 %v1847_v8  ;;  %1589 = vmatpush1.bf16.msra.mxu0 %v1931_v10 }
   0xd   :  { %511 = vmatprep.mubr.f32.mxu1 %v1847_v8  ;;  %1601 = vmatpush1.bf16.msra.mxu1 %v1910_v4 }
   0xe   :  { %1530 = vmatmul.mubr.msk.f32.gmra.mrb[4].mxu0 %vm50_vm1, %v39_v38  ;;  %1603 = vmatprep.subr.bf16.mxu1 %v1972_v35 }
   0xf   :  { %1532 = vmatprep.mubr.msk.f32.mxu0 %vm50_vm1, %v40_v40  ;;  %1591 = vmatprep.subr.bf16.mxu0 %v1994_v41 }
  0x10   :  { %1593 = vmatpush1.bf16.msra.mxu0 %v2016_v47 }
  0x11   :  { %1605 = vmatpush1.bf16.msra.mxu1 %v1931_v10  ;;  %1595 = vmatprep.subr.bf16.mxu0 %v2019_v48 }
  0x12   :  { %1533 = vmatmul.mubr.msk.f32.gmra.mrb[6].mxu0 %vm50_vm1, %v41_v46  ;;  %1607 = vmatprep.subr.bf16.mxu1 %v1994_v41 }
  0x13   :  { %371 = vmatprep.mubr.f32.mxu0 %v1847_v8 }
  0x14   :  { %1597 = vmatpush1.bf16.msra.mxu0 %v2033_v52 }
  0x15   :  { %1609 = vmatpush1.bf16.msra.mxu1 %v2016_v47  ;;  %1615 = vmatprep.subr.bf16.mxu0 %v1959_v31 }
  0x16   :  { %1611 = vmatprep.subr.bf16.mxu1 %v2019_v48 }
  0x19   :  { %1613 = vmatpush1.bf16.msra.mxu1 %v2033_v52 }
  0x1a   :  { %1631 = vmatprep.subr.bf16.mxu1 %v1959_v31 }
  0xd8   :  { %v1937_v11 = vpop.f32.mrb[0].mxu0 }
  0xd9   :  { %v145_v13 = vpop.f32.mrb[1].mxu0  ;;  %v151_v63 = vadd.f32 %v1937_v11, %v1942_v12 }
  0xda   :  { %v146_v14 = vadd.f32 %v1942_v12, %v145_v13 }
  0xdc   :  { %v2043_v55 = vpop.f32.mrb[2].mxu0 }
  0xdd   :  { %v2045_v56 = vpop.f32.mrb[3].mxu0 }
  0xde   :  { %v156_v42 = vadd.f32 %v1942_v12, %v2045_v56 }
  0xdf   :  { %v270_v15 = vpop.f32.mrb[0].mxu1 }
  0xe0   :  { %v271_v16 = vadd.f32 %v270_v15, %v146_v14  ;;  %v1545_v17 = vpop.f32.mrb[1].mxu1 }
  0xe1   :  { %v2047_v57 = vpop.f32.mrb[4].mxu0 }
  0xe2   :  { %1717 = vtanh.f32 %v271_v16  ;;  %v1464_v19 = vmul.f32 -1.442695, %v271_v16  ;;  %v2049_v58 = vpop.f32.mrb[5].mxu0 }
  0xe4   :  { %1719 = vpow2.f32 %v1464_v19 }
  0xe5   :  { %v2051_v59 = vpop.f32.mrb[6].mxu0 }
  0xe6   :  { %v2053_v60 = vpop.f32.mrb[7].mxu0 }
  0xec   :  { %v1718_v18 = vpop.eup %1717 }
  0xed   :  { %283 = vrot.lane.b32.xlu0 %v1718_v18, %s1848_s24 }
  0xee   :  { %v1720_v20 = vpop.eup %1719 }
  0xef   :  { %v277_v21 = vadd.f32 1.0, %v1720_v20 }
  0xf1   :  { %1721 = vrcp.f32 %v277_v21 }
  0xfb   :  { %v1722_v22 = vpop.eup %1721 }
  0xfc   :  { %v281_v25 = vmul.f32 0.0, %v1722_v22 }
 0x15f   :  { %v284_v23 = vpop.permute.xlu0 %283 }
 0x160   :  { %v286_v24 = vmul.f32 %v1722_v22, %v284_v23 }
 0x162   :  { %288 = vrot.lane.b32.xlu0 %v286_v24, %s1849_s2 }
 0x1d4   :  { %v289_v26 = vpop.permute.xlu0 %288 }
 0x1d5   :  { %v1947_v27 = vadd.f32 %v289_v26, %v281_v25 }
 0x1d7   :  { %1723 = vtanh.f32 %v1947_v27 }
 0x1e1   :  { %v1724_v51 = vpop.eup %1723 }
 0x1e2   :  { %294 = vrot.lane.b32.xlu1 %v1724_v51, %s1848_s24 }
 0x254   :  { %v295_v53 = vpop.permute.xlu1 %294 }
 0x255   :  { %v297_v54 = vmul.f32 %v1722_v22, %v295_v53 }
 0x257   :  { %299 = vrot.lane.b32.xlu1 %v297_v54, %s1849_s2 }
 0x2c9   :  { %v300_v61 = vpop.permute.xlu1 %299 }
 0x2ca   :  { %v302_v62 = vsel %vm200_vm3, %v300_v61, 0.0 }
 0x2cb   :  { %1465 = vmatmul.mubr.msk.f32.vlgmr.msra.gmra.mrb[8].mxu0 %vm303_vm4, %v302_v62 }
 0x2cc   :  { %1617 = vmatpush1.bf16.msra.mxu0 %v1910_v4  ;;  %644 = vmatprep.mubr.f32.mxu0 %v1847_v8 }
 0x2cd   :  { %1619 = vmatprep.subr.bf16.mxu0 %v1972_v35 }
 0x2d0   :  { %1621 = vmatpush1.bf16.msra.mxu0 %v1931_v10 }
 0x2d1   :  { %1623 = vmatprep.subr.bf16.mxu0 %v1994_v41 }
 0x2d4   :  { %1625 = vmatpush1.bf16.msra.mxu0 %v2016_v47 }
 0x2d5   :  { %1627 = vmatprep.subr.bf16.mxu0 %v2019_v48 }
 0x2d8   :  { %1629 = vmatpush1.bf16.msra.mxu0 %v2033_v52 }
 0x2d9   :  { %1647 = vmatprep.subr.bf16.mxu0 %v1959_v31 }
 0x39e   :  { %v373_v2 = vpop.f32.mrb[8].mxu0 }
 0x39f   :  { %v378_v3 = vadd.f32 %v373_v2, %v151_v63  ;;  %v375_v5 = vpop.f32.mrb[9].mxu0 }
 0x3a0   :  { %v410_v6 = vadd.f32 %v2071_v1, %v375_v5 }
 0x3a1   :  { %1725 = vtanh.f32 %v378_v3  ;;  %v1466_v13 = vmul.f32 -1.442695, %v378_v3 }
 0x3a2   :  { %1727 = vtanh.f32 %v410_v6  ;;  %v1468_v11 = vmul.f32 -1.442695, %v410_v6 }
 0x3a3   :  { %1729 = vpow2.f32 %v1466_v13 }
 0x3a4   :  { %1731 = vpow2.f32 %v1468_v11 }
 0x3ab   :  { %v1726_v7 = vpop.eup %1725 }
 0x3ac   :  { %v1728_v9 = vpop.eup %1727  ;;  %388 = vrot.lane.b32.xlu0 %v1726_v7, %s1848_s24 }
 0x3ad   :  { %420 = vrot.lane.b32.xlu1 %v1728_v9, %s1848_s24  ;;  %v1730_v14 = vpop.eup %1729 }
 0x3ae   :  { %v1732_v15 = vpop.eup %1731  ;;  %v382_v16 = vadd.f32 1.0, %v1730_v14 }
 0x3af   :  { %v414_v17 = vadd.f32 1.0, %v1732_v15 }
 0x3b0   :  { %1733 = vrcp.f32 %v382_v16 }
 0x3b1   :  { %1735 = vrcp.f32 %v414_v17 }
 0x3ba   :  { %v1734_v18 = vpop.eup %1733 }
 0x3bb   :  { %v1736_v20 = vpop.eup %1735  ;;  %v386_v24 = vmul.f32 %v1734_v18, %v1947_v27 }
 0x3bc   :  { %v418_v26 = vmul.f32 0.0, %v1736_v20 }
 0x41e   :  { %v389_v19 = vpop.permute.xlu0 %388 }
 0x41f   :  { %v391_v21 = vmul.f32 %v1734_v18, %v389_v19  ;;  %v421_v22 = vpop.permute.xlu1 %420 }
 0x420   :  { %v423_v23 = vmul.f32 %v1736_v20, %v421_v22 }
 0x421   :  { %393 = vrot.lane.b32.xlu0 %v391_v21, %s1849_s2 }
 0x422   :  { %425 = vrot.lane.b32.xlu1 %v423_v23, %s1849_s2 }
 0x493   :  { %v394_v25 = vpop.permute.xlu0 %393 }
 0x494   :  { %v396_v28 = vadd.f32 %v394_v25, %v386_v24  ;;  %v426_v29 = vpop.permute.xlu1 %425 }
 0x495   :  { %v428_v30 = vadd.f32 %v426_v29, %v418_v26  ;;  %v161_v26 = vadd.f32 %v2043_v55, %v1942_v12 }
 0x496   :  { %1737 = vtanh.f32 %v396_v28 }
 0x497   :  { %1739 = vtanh.f32 %v428_v30 }
 0x4a0   :  { %v1738_v32 = vpop.eup %1737 }
 0x4a1   :  { %v1740_v33 = vpop.eup %1739  ;;  %399 = vrot.lane.b32.xlu0 %v1738_v32, %s1848_s24 }
 0x4a2   :  { %431 = vrot.lane.b32.xlu1 %v1740_v33, %s1848_s24 }
 0x513   :  { %v400_v34 = vpop.permute.xlu0 %399 }
 0x514   :  { %v402_v36 = vmul.f32 %v1734_v18, %v400_v34  ;;  %v432_v37 = vpop.permute.xlu1 %431 }
 0x515   :  { %v434_v38 = vmul.f32 %v1736_v20, %v432_v37 }
 0x516   :  { %436 = vrot.lane.b32.xlu0 %v402_v36, %s1849_s2 }
 0x517   :  { %440 = vrot.lane.b32.xlu1 %v434_v38, %s1848_s24 }
 0x588   :  { %v437_v27 = vpop.permute.xlu0 %436 }
 0x589   :  { %v441_v39 = vpop.permute.xlu1 %440 }
 0x58a   :  { %v443_v40 = vsel %vm200_vm3, %v437_v27, %v441_v39 }
 0x58b   :  { %1469 = vmatmul.mubr.msk.f32.vlgmr.msra.gmra.mrb[2].mxu1 %vm303_vm4, %v443_v40 }
 0x58c   :  { %1633 = vmatpush1.bf16.msra.mxu1 %v1910_v4  ;;  %777 = vmatprep.mubr.f32.mxu1 %v1847_v8 }
 0x58d   :  { %1635 = vmatprep.subr.bf16.mxu1 %v1972_v35 }
 0x590   :  { %1637 = vmatpush1.bf16.msra.mxu1 %v1931_v10 }
 0x591   :  { %1639 = vmatprep.subr.bf16.mxu1 %v1994_v41 }
 0x594   :  { %1641 = vmatpush1.bf16.msra.mxu1 %v2016_v47 }
 0x595   :  { %1643 = vmatprep.subr.bf16.mxu1 %v2019_v48 }
 0x598   :  { %1645 = vmatpush1.bf16.msra.mxu1 %v2033_v52 }
 0x599   :  { %1663 = vmatprep.subr.bf16.mxu1 %v1959_v31 }
 0x65e   :  { %v513_v43 = vpop.f32.mrb[2].mxu1 }
 0x65f   :  { %v518_v44 = vadd.f32 %v513_v43, %v156_v42  ;;  %v515_v45 = vpop.f32.mrb[3].mxu1 }
 0x660   :  { %v543_v46 = vadd.f32 %v2071_v1, %v515_v45 }
 0x661   :  { %1741 = vtanh.f32 %v518_v44  ;;  %v1470_v51 = vmul.f32 -1.442695, %v518_v44 }
 0x662   :  { %1743 = vtanh.f32 %v543_v46  ;;  %v1471_v53 = vmul.f32 -1.442695, %v543_v46 }
 0x663   :  { %1745 = vpow2.f32 %v1470_v51 }
 0x664   :  { %1747 = vpow2.f32 %v1471_v53 }
 0x66b   :  { %v1742_v49 = vpop.eup %1741 }
 0x66c   :  { %v1744_v50 = vpop.eup %1743  ;;  %528 = vrot.lane.b32.xlu0 %v1742_v49, %s1848_s24 }
 0x66d   :  { %553 = vrot.lane.b32.xlu1 %v1744_v50, %s1848_s24  ;;  %v1746_v54 = vpop.eup %1745 }
 0x66e   :  { %v1748_v61 = vpop.eup %1747  ;;  %v522_v56 = vadd.f32 1.0, %v1746_v54 }
 0x66f   :  { %v547_v62 = vadd.f32 1.0, %v1748_v61 }
 0x670   :  { %1749 = vrcp.f32 %v522_v56 }
 0x671   :  { %1751 = vrcp.f32 %v547_v62 }
 0x67a   :  { %v1750_v63 = vpop.eup %1749 }
 0x67b   :  { %v1752_v3 = vpop.eup %1751  ;;  %v526_v9 = vmul.f32 %v1750_v63, %v396_v28 }
 0x67c   :  { %v551_v11 = vmul.f32 %v1752_v3, %v428_v30 }
 0x6de   :  { %v529_v2 = vpop.permute.xlu0 %528 }
 0x6df   :  { %v531_v5 = vmul.f32 %v1750_v63, %v529_v2  ;;  %v554_v6 = vpop.permute.xlu1 %553 }
 0x6e0   :  { %v556_v7 = vmul.f32 %v1752_v3, %v554_v6 }
 0x6e1   :  { %533 = vrot.lane.b32.xlu0 %v531_v5, %s1849_s2 }
 0x6e2   :  { %558 = vrot.lane.b32.xlu1 %v556_v7, %s1849_s2 }
 0x753   :  { %v534_v13 = vpop.permute.xlu0 %533 }
 0x754   :  { %v536_v14 = vadd.f32 %v534_v13, %v526_v9  ;;  %v559_v15 = vpop.permute.xlu1 %558  ;;  %v166_v13 = vadd.f32 %v1942_v12, %v2049_v58 }
 0x755   :  { %v561_v16 = vadd.f32 %v559_v15, %v551_v11 }
 0x756   :  { %1753 = vtanh.f32 %v536_v14 }
 0x757   :  { %1755 = vtanh.f32 %v561_v16 }
 0x760   :  { %v1754_v17 = vpop.eup %1753 }
 0x761   :  { %v1756_v18 = vpop.eup %1755  ;;  %539 = vrot.lane.b32.xlu0 %v1754_v17, %s1848_s24 }
 0x762   :  { %564 = vrot.lane.b32.xlu1 %v1756_v18, %s1848_s24 }
 0x7d3   :  { %v540_v19 = vpop.permute.xlu0 %539 }
 0x7d4   :  { %v542_v20 = vmul.f32 %v1750_v63, %v540_v19  ;;  %v565_v21 = vpop.permute.xlu1 %564 }
 0x7d5   :  { %v567_v22 = vmul.f32 %v1752_v3, %v565_v21 }
 0x7d6   :  { %569 = vrot.lane.b32.xlu0 %v542_v20, %s1849_s2 }
 0x7d7   :  { %573 = vrot.lane.b32.xlu1 %v567_v22, %s1848_s24 }
 0x848   :  { %v570_v23 = vpop.permute.xlu0 %569 }
 0x849   :  { %v574_v24 = vpop.permute.xlu1 %573 }
 0x84a   :  { %v576_v25 = vsel %vm200_vm3, %v570_v23, %v574_v24 }
 0x84b   :  { %1472 = vmatmul.mubr.msk.f32.vlgmr.msra.gmra.mrb[10].mxu0 %vm303_vm4, %v576_v25 }
 0x84c   :  { %1649 = vmatpush1.bf16.msra.mxu0 %v1910_v4  ;;  %910 = vmatprep.mubr.f32.mxu0 %v1847_v8 }
 0x84d   :  { %1651 = vmatprep.subr.bf16.mxu0 %v1972_v35 }
 0x850   :  { %1653 = vmatpush1.bf16.msra.mxu0 %v1931_v10 }
 0x851   :  { %1655 = vmatprep.subr.bf16.mxu0 %v1994_v41 }
 0x854   :  { %1657 = vmatpush1.bf16.msra.mxu0 %v2016_v47 }
 0x855   :  { %1659 = vmatprep.subr.bf16.mxu0 %v2019_v48 }
 0x858   :  { %1661 = vmatpush1.bf16.msra.mxu0 %v2033_v52 }
 0x859   :  { %1679 = vmatprep.subr.bf16.mxu0 %v1959_v31 }
 0x91e   :  { %v646_v28 = vpop.f32.mrb[10].mxu0 }
 0x91f   :  { %v651_v29 = vadd.f32 %v646_v28, %v161_v26  ;;  %v648_v30 = vpop.f32.mrb[11].mxu0 }
 0x920   :  { %v676_v32 = vadd.f32 %v2071_v1, %v648_v30 }
 0x921   :  { %1757 = vtanh.f32 %v651_v29  ;;  %v1473_v36 = vmul.f32 -1.442695, %v651_v29 }
 0x922   :  { %1759 = vtanh.f32 %v676_v32  ;;  %v1474_v37 = vmul.f32 -1.442695, %v676_v32 }
 0x923   :  { %1761 = vpow2.f32 %v1473_v36 }
 0x924   :  { %1763 = vpow2.f32 %v1474_v37 }
 0x92b   :  { %v1758_v33 = vpop.eup %1757 }
 0x92c   :  { %v1760_v34 = vpop.eup %1759  ;;  %661 = vrot.lane.b32.xlu0 %v1758_v33, %s1848_s24 }
 0x92d   :  { %686 = vrot.lane.b32.xlu1 %v1760_v34, %s1848_s24  ;;  %v1762_v38 = vpop.eup %1761 }
 0x92e   :  { %v1764_v27 = vpop.eup %1763  ;;  %v655_v55 = vadd.f32 1.0, %v1762_v38 }
 0x92f   :  { %v680_v39 = vadd.f32 1.0, %v1764_v27 }
 0x930   :  { %1765 = vrcp.f32 %v655_v55 }
 0x931   :  { %1767 = vrcp.f32 %v680_v39 }
 0x93a   :  { %v1766_v40 = vpop.eup %1765 }
 0x93b   :  { %v1768_v43 = vpop.eup %1767  ;;  %v659_v49 = vmul.f32 %v1766_v40, %v536_v14 }
 0x93c   :  { %v684_v51 = vmul.f32 %v1768_v43, %v561_v16 }
 0x99e   :  { %v662_v42 = vpop.permute.xlu0 %661 }
 0x99f   :  { %v664_v44 = vmul.f32 %v1766_v40, %v662_v42  ;;  %v687_v45 = vpop.permute.xlu1 %686 }
 0x9a0   :  { %v689_v46 = vmul.f32 %v1768_v43, %v687_v45 }
 0x9a1   :  { %666 = vrot.lane.b32.xlu0 %v664_v44, %s1849_s2 }
 0x9a2   :  { %691 = vrot.lane.b32.xlu1 %v689_v46, %s1849_s2 }
 0xa13   :  { %v667_v50 = vpop.permute.xlu0 %666 }
 0xa14   :  { %v669_v53 = vadd.f32 %v667_v50, %v659_v49  ;;  %v692_v54 = vpop.permute.xlu1 %691  ;;  %v171_v49 = vadd.f32 %v2047_v57, %v1942_v12 }
 0xa15   :  { %v694_v61 = vadd.f32 %v692_v54, %v684_v51 }
 0xa16   :  { %1769 = vtanh.f32 %v669_v53 }
 0xa17   :  { %1771 = vtanh.f32 %v694_v61 }
 0xa20   :  { %v1770_v56 = vpop.eup %1769 }
 0xa21   :  { %v1772_v62 = vpop.eup %1771  ;;  %672 = vrot.lane.b32.xlu0 %v1770_v56, %s1848_s24 }
 0xa22   :  { %697 = vrot.lane.b32.xlu1 %v1772_v62, %s1848_s24 }
 0xa93   :  { %v673_v63 = vpop.permute.xlu0 %672 }
 0xa94   :  { %v675_v2 = vmul.f32 %v1766_v40, %v673_v63  ;;  %v698_v3 = vpop.permute.xlu1 %697 }
 0xa95   :  { %v700_v5 = vmul.f32 %v1768_v43, %v698_v3 }
 0xa96   :  { %702 = vrot.lane.b32.xlu0 %v675_v2, %s1849_s2 }
 0xa97   :  { %706 = vrot.lane.b32.xlu1 %v700_v5, %s1848_s24 }
 0xb08   :  { %v703_v6 = vpop.permute.xlu0 %702 }
 0xb09   :  { %v707_v7 = vpop.permute.xlu1 %706 }
 0xb0a   :  { %v709_v9 = vsel %vm200_vm3, %v703_v6, %v707_v7 }
 0xb0b   :  { %1475 = vmatmul.mubr.msk.f32.vlgmr.msra.gmra.mrb[4].mxu1 %vm303_vm4, %v709_v9 }
 0xb0c   :  { %1665 = vmatpush1.bf16.msra.mxu1 %v1910_v4  ;;  %1043 = vmatprep.mubr.f32.mxu1 %v1847_v8 }
 0xb0d   :  { %1667 = vmatprep.subr.bf16.mxu1 %v1972_v35 }
 0xb10   :  { %1669 = vmatpush1.bf16.msra.mxu1 %v1931_v10 }
 0xb11   :  { %1671 = vmatprep.subr.bf16.mxu1 %v1994_v41 }
 0xb14   :  { %1673 = vmatpush1.bf16.msra.mxu1 %v2016_v47 }
 0xb15   :  { %1675 = vmatprep.subr.bf16.mxu1 %v2019_v48 }
 0xb18   :  { %1677 = vmatpush1.bf16.msra.mxu1 %v2033_v52 }
 0xb19   :  { %1694 = vmatprep.subr.bf16.mxu1 %v1845_v0 }
 0xbde   :  { %v779_v11 = vpop.f32.mrb[4].mxu1 }
 0xbdf   :  { %v784_v14 = vadd.f32 %v779_v11, %v166_v13  ;;  %v781_v15 = vpop.f32.mrb[5].mxu1 }
 0xbe0   :  { %v809_v16 = vadd.f32 %v2071_v1, %v781_v15 }
 0xbe1   :  { %1773 = vtanh.f32 %v784_v14  ;;  %v1476_v19 = vmul.f32 -1.442695, %v784_v14 }
 0xbe2   :  { %1775 = vtanh.f32 %v809_v16  ;;  %v1477_v20 = vmul.f32 -1.442695, %v809_v16 }
 0xbe3   :  { %1777 = vpow2.f32 %v1476_v19 }
 0xbe4   :  { %1779 = vpow2.f32 %v1477_v20 }
 0xbeb   :  { %v1774_v17 = vpop.eup %1773 }
 0xbec   :  { %v1776_v18 = vpop.eup %1775  ;;  %794 = vrot.lane.b32.xlu0 %v1774_v17, %s1848_s24 }
 0xbed   :  { %819 = vrot.lane.b32.xlu1 %v1776_v18, %s1848_s24  ;;  %v1778_v21 = vpop.eup %1777 }
 0xbee   :  { %v1780_v22 = vpop.eup %1779  ;;  %v788_v58 = vadd.f32 1.0, %v1778_v21 }
 0xbef   :  { %v813_v23 = vadd.f32 1.0, %v1780_v22 }
 0xbf0   :  { %1781 = vrcp.f32 %v788_v58 }
 0xbf1   :  { %1783 = vrcp.f32 %v813_v23 }
 0xbfa   :  { %v1782_v24 = vpop.eup %1781 }
 0xbfb   :  { %v1784_v26 = vpop.eup %1783  ;;  %v792_v32 = vmul.f32 %v1782_v24, %v669_v53 }
 0xbfc   :  { %v817_v34 = vmul.f32 %v1784_v26, %v694_v61 }
 0xc5e   :  { %v795_v25 = vpop.permute.xlu0 %794 }
 0xc5f   :  { %v797_v28 = vmul.f32 %v1782_v24, %v795_v25  ;;  %v820_v29 = vpop.permute.xlu1 %819  ;;  %v176_v25 = vadd.f32 %v1942_v12, %v2053_v60 }
 0xc60   :  { %v822_v30 = vmul.f32 %v1784_v26, %v820_v29 }
 0xc61   :  { %799 = vrot.lane.b32.xlu0 %v797_v28, %s1849_s2 }
 0xc62   :  { %824 = vrot.lane.b32.xlu1 %v822_v30, %s1849_s2 }
 0xcd3   :  { %v800_v33 = vpop.permute.xlu0 %799 }
 0xcd4   :  { %v802_v36 = vadd.f32 %v800_v33, %v792_v32  ;;  %v825_v37 = vpop.permute.xlu1 %824 }
 0xcd5   :  { %v827_v38 = vadd.f32 %v825_v37, %v817_v34 }
 0xcd6   :  { %1785 = vtanh.f32 %v802_v36 }
 0xcd7   :  { %1787 = vtanh.f32 %v827_v38 }
 0xce0   :  { %v1786_v27 = vpop.eup %1785 }
 0xce1   :  { %v1788_v55 = vpop.eup %1787  ;;  %805 = vrot.lane.b32.xlu0 %v1786_v27, %s1848_s24 }
 0xce2   :  { %830 = vrot.lane.b32.xlu1 %v1788_v55, %s1848_s24 }
 0xd53   :  { %v806_v39 = vpop.permute.xlu0 %805 }
 0xd54   :  { %v808_v40 = vmul.f32 %v1782_v24, %v806_v39  ;;  %v831_v42 = vpop.permute.xlu1 %830 }
 0xd55   :  { %v833_v43 = vmul.f32 %v1784_v26, %v831_v42 }
 0xd56   :  { %835 = vrot.lane.b32.xlu0 %v808_v40, %s1849_s2 }
 0xd57   :  { %839 = vrot.lane.b32.xlu1 %v833_v43, %s1848_s24 }
 0xdc8   :  { %v836_v44 = vpop.permute.xlu0 %835 }
 0xdc9   :  { %v840_v45 = vpop.permute.xlu1 %839 }
 0xdca   :  { %v842_v46 = vsel %vm200_vm3, %v836_v44, %v840_v45 }
 0xdcb   :  { %1478 = vmatmul.mubr.msk.f32.vlgmr.msra.gmra.mrb[12].mxu0 %vm303_vm4, %v842_v46 }
 0xdcc   :  { %1681 = vmatpush1.bf16.msra.mxu0 %v1910_v4  ;;  %1176 = vmatprep.mubr.f32.mxu0 %v1847_v8 }
 0xdcd   :  { %1683 = vmatprep.subr.bf16.mxu0 %v1972_v35 }
 0xdd0   :  { %1685 = vmatpush1.bf16.msra.mxu0 %v1931_v10 }
 0xdd1   :  { %1687 = vmatprep.subr.bf16.mxu0 %v1994_v41 }
 0xdd4   :  { %1689 = vmatpush1.bf16.msra.mxu0 %v2016_v47 }
 0xdd5   :  { %1691 = vmatprep.subr.bf16.mxu0 %v2019_v48 }
 0xdd8   :  { %1693 = vmatpush1.bf16.msra.mxu0 %v2033_v52 }
 0xdd9   :  { %1706 = vmatprep.subr.bf16.mxu0 %v1845_v0 }
 0xe9e   :  { %v912_v4 = vpop.f32.mrb[12].mxu0 }
 0xe9f   :  { %v917_v50 = vadd.f32 %v912_v4, %v171_v49  ;;  %v914_v51 = vpop.f32.mrb[13].mxu0 }
 0xea0   :  { %v942_v53 = vadd.f32 %v2071_v1, %v914_v51 }
 0xea1   :  { %1789 = vtanh.f32 %v917_v50  ;;  %v1479_v47 = vmul.f32 -1.442695, %v917_v50 }
 0xea2   :  { %1791 = vtanh.f32 %v942_v53  ;;  %v1480_v52 = vmul.f32 -1.442695, %v942_v53 }
 0xea3   :  { %1793 = vpow2.f32 %v1479_v47 }
 0xea4   :  { %1795 = vpow2.f32 %v1480_v52 }
 0xeab   :  { %v1790_v10 = vpop.eup %1789 }
 0xeac   :  { %v1792_v54 = vpop.eup %1791  ;;  %927 = vrot.lane.b32.xlu0 %v1790_v10, %s1848_s24 }
 0xead   :  { %952 = vrot.lane.b32.xlu1 %v1792_v54, %s1848_s24  ;;  %v1794_v61 = vpop.eup %1793 }
 0xeae   :  { %v1796_v56 = vpop.eup %1795  ;;  %v921_v57 = vadd.f32 1.0, %v1794_v61  ;;  %v181_v61 = vadd.f32 %v2051_v59, %v1942_v12 }
 0xeaf   :  { %v946_v62 = vadd.f32 1.0, %v1796_v56 }
 0xeb0   :  { %1797 = vrcp.f32 %v921_v57 }
 0xeb1   :  { %1799 = vrcp.f32 %v946_v62 }
 0xeba   :  { %v1798_v63 = vpop.eup %1797 }
 0xebb   :  { %v1800_v3 = vpop.eup %1799  ;;  %v925_v9 = vmul.f32 %v1798_v63, %v802_v36 }
 0xebc   :  { %v950_v11 = vmul.f32 %v1800_v3, %v827_v38 }
 0xf1e   :  { %v928_v2 = vpop.permute.xlu0 %927 }
 0xf1f   :  { %v930_v5 = vmul.f32 %v1798_v63, %v928_v2  ;;  %v953_v6 = vpop.permute.xlu1 %952 }
 0xf20   :  { %v955_v7 = vmul.f32 %v1800_v3, %v953_v6 }
 0xf21   :  { %932 = vrot.lane.b32.xlu0 %v930_v5, %s1849_s2 }
 0xf22   :  { %957 = vrot.lane.b32.xlu1 %v955_v7, %s1849_s2 }
 0xf93   :  { %v933_v13 = vpop.permute.xlu0 %932 }
 0xf94   :  { %v935_v14 = vadd.f32 %v933_v13, %v925_v9  ;;  %v958_v15 = vpop.permute.xlu1 %957 }
 0xf95   :  { %v960_v16 = vadd.f32 %v958_v15, %v950_v11 }
 0xf96   :  { %1801 = vtanh.f32 %v935_v14 }
 0xf97   :  { %1803 = vtanh.f32 %v960_v16 }
 0xfa0   :  { %v1802_v17 = vpop.eup %1801 }
 0xfa1   :  { %v1804_v18 = vpop.eup %1803  ;;  %938 = vrot.lane.b32.xlu0 %v1802_v17, %s1848_s24 }
 0xfa2   :  { %963 = vrot.lane.b32.xlu1 %v1804_v18, %s1848_s24 }
0x1013   :  { %v939_v19 = vpop.permute.xlu0 %938 }
0x1014   :  { %v941_v20 = vmul.f32 %v1798_v63, %v939_v19  ;;  %v964_v21 = vpop.permute.xlu1 %963 }
0x1015   :  { %v966_v22 = vmul.f32 %v1800_v3, %v964_v21 }
0x1016   :  { %968 = vrot.lane.b32.xlu0 %v941_v20, %s1849_s2 }
0x1017   :  { %972 = vrot.lane.b32.xlu1 %v966_v22, %s1848_s24 }
0x1088   :  { %v969_v58 = vpop.permute.xlu0 %968 }
0x1089   :  { %v973_v23 = vpop.permute.xlu1 %972 }
0x108a   :  { %v975_v24 = vsel %vm200_vm3, %v969_v58, %v973_v23 }
0x108b   :  { %1481 = vmatmul.mubr.msk.f32.vlgmr.msra.gmra.mrb[6].mxu1 %vm303_vm4, %v975_v24 }
0x108c   :  { %1696 = vmatpush3.bf16.msra.mxu1 %v1959_v31  ;;  %1562 = vmatprep.mubr.msk.f32.mxu1 %vm1846_vm2, %v1847_v8 }
0x108d   :  { %1697 = vmatprep.subr.bf16.mxu1 %v1845_v0 }
0x1090   :  { %1699 = vmatpush3.bf16.msra.mxu1 %v1972_v35 }
0x1091   :  { %1700 = vmatprep.subr.bf16.mxu1 %v1845_v0 }
0x1094   :  { %1702 = vmatpush3.bf16.msra.mxu1 %v1994_v41 }
0x1095   :  { %1703 = vmatprep.subr.bf16.mxu1 %v1845_v0 }
0x1098   :  { %1705 = vmatpush3.bf16.msra.mxu1 %v2019_v48 }
0x115e   :  { %v1045_v26 = vpop.f32.mrb[6].mxu1 }
0x115f   :  { %v1050_v31 = vadd.f32 %v1045_v26, %v176_v25  ;;  %v1047_v28 = vpop.f32.mrb[7].mxu1 }
0x1160   :  { %v1075_v29 = vadd.f32 %v2071_v1, %v1047_v28 }
0x1161   :  { %1805 = vtanh.f32 %v1050_v31  ;;  %v1482_v41 = vmul.f32 -1.442695, %v1050_v31 }
0x1162   :  { %1807 = vtanh.f32 %v1075_v29  ;;  %v1483_v32 = vmul.f32 -1.442695, %v1075_v29 }
0x1163   :  { %1809 = vpow2.f32 %v1482_v41 }
0x1164   :  { %1811 = vpow2.f32 %v1483_v32 }
0x116b   :  { %v1806_v30 = vpop.eup %1805 }
0x116c   :  { %v1808_v35 = vpop.eup %1807  ;;  %1060 = vrot.lane.b32.xlu0 %v1806_v30, %s1848_s24 }
0x116d   :  { %1085 = vrot.lane.b32.xlu1 %v1808_v35, %s1848_s24  ;;  %v1810_v48 = vpop.eup %1809 }
0x116e   :  { %v1812_v33 = vpop.eup %1811  ;;  %v1054_v60 = vadd.f32 1.0, %v1810_v48 }
0x116f   :  { %v1079_v34 = vadd.f32 1.0, %v1812_v33 }
0x1170   :  { %1813 = vrcp.f32 %v1054_v60 }
0x1171   :  { %1815 = vrcp.f32 %v1079_v34 }
0x117a   :  { %v1814_v36 = vpop.eup %1813 }
0x117b   :  { %v1816_v38 = vpop.eup %1815  ;;  %v1058_v40 = vmul.f32 %v1814_v36, %v935_v14 }
0x117c   :  { %v1083_v43 = vmul.f32 %v1816_v38, %v960_v16 }
0x11de   :  { %v1061_v37 = vpop.permute.xlu0 %1060 }
0x11df   :  { %v1063_v27 = vmul.f32 %v1814_v36, %v1061_v37  ;;  %v1086_v55 = vpop.permute.xlu1 %1085 }
0x11e0   :  { %v1088_v39 = vmul.f32 %v1816_v38, %v1086_v55 }
0x11e1   :  { %1065 = vrot.lane.b32.xlu0 %v1063_v27, %s1849_s2 }
0x11e2   :  { %1090 = vrot.lane.b32.xlu1 %v1088_v39, %s1849_s2 }
0x1253   :  { %v1066_v42 = vpop.permute.xlu0 %1065 }
0x1254   :  { %v1068_v44 = vadd.f32 %v1066_v42, %v1058_v40  ;;  %v1091_v45 = vpop.permute.xlu1 %1090  ;;  %v1340_v40 = vld [vmem:[%s2246_s5 + $0x8] sm:$0xff]  ;;  %v1341_v42 = vld [vmem:[%s2246_s5 + $0x10] sm:$0xff] }
0x1255   :  { %v1093_v46 = vadd.f32 %v1091_v45, %v1083_v43 }
0x1256   :  { %1817 = vtanh.f32 %v1068_v44 }
0x1257   :  { %1819 = vtanh.f32 %v1093_v46 }
0x1260   :  { %v1818_v49 = vpop.eup %1817 }
0x1261   :  { %v1820_v4 = vpop.eup %1819  ;;  %1071 = vrot.lane.b32.xlu0 %v1818_v49, %s1848_s24 }
0x1262   :  { %1096 = vrot.lane.b32.xlu1 %v1820_v4, %s1848_s24 }
0x12d3   :  { %v1072_v50 = vpop.permute.xlu0 %1071 }
0x12d4   :  { %v1074_v51 = vmul.f32 %v1814_v36, %v1072_v50  ;;  %v1097_v53 = vpop.permute.xlu1 %1096 }
0x12d5   :  { %v1099_v10 = vmul.f32 %v1816_v38, %v1097_v53 }
0x12d6   :  { %1101 = vrot.lane.b32.xlu0 %v1074_v51, %s1849_s2  ;;  %v14_v51 = vstv %s2247_s8 }
0x12d7   :  { %1105 = vrot.lane.b32.xlu1 %v1099_v10, %s1848_s24  ;;  %15 = vst [vmem:[#allocation2] sm:$0x1] %v14_v51 }
0x1348   :  { %v1102_v54 = vpop.permute.xlu0 %1101 }
0x1349   :  { %v1106_v47 = vpop.permute.xlu1 %1105 }
0x134a   :  { %v1108_v52 = vsel %vm200_vm3, %v1102_v54, %v1106_v47 }
0x134b   :  { %1484 = vmatmul.mubr.msk.f32.vlgmr.msra.gmra.mrb[14].mxu0 %vm303_vm4, %v1108_v52  ;;  %v1491_v52 = vld [vmem:[%s2249_s7] ss:$0 sm:$0xff] }
0x134c   :  { %1573 = vmatprep.mubr.msk.f32.mxu0 %vm1846_vm2, %v1847_v8 }
0x141e   :  { %v1178_v56 = vpop.f32.mrb[14].mxu0 }
0x141f   :  { %v1183_v57 = vadd.f32 %v1178_v56, %v181_v61  ;;  %v1180_v62 = vpop.f32.mrb[15].mxu0 }
0x1420   :  { %v1208_v63 = vadd.f32 %v2071_v1, %v1180_v62  ;;  %v1492_v62 = vld [vmem:[#allocation2] ss:$0 sm:$0xff] }
0x1421   :  { %1821 = vtanh.f32 %v1183_v57  ;;  %v1485_v5 = vmul.f32 -1.442695, %v1183_v57 }
0x1422   :  { %1823 = vtanh.f32 %v1208_v63  ;;  %v1486_v6 = vmul.f32 -1.442695, %v1208_v63 }
0x1423   :  { %1825 = vpow2.f32 %v1485_v5 }
0x1424   :  { %1827 = vpow2.f32 %v1486_v6 }
0x142b   :  { %v1822_v2 = vpop.eup %1821 }
0x142c   :  { %v1824_v3 = vpop.eup %1823  ;;  %1193 = vrot.lane.b32.xlu0 %v1822_v2, %s1848_s24 }
0x142d   :  { %1218 = vrot.lane.b32.xlu1 %v1824_v3, %s1848_s24  ;;  %v1826_v8 = vpop.eup %1825 }
0x142e   :  { %v1828_v7 = vpop.eup %1827  ;;  %v1187_v12 = vadd.f32 1.0, %v1826_v8 }
0x142f   :  { %v1212_v59 = vadd.f32 1.0, %v1828_v7 }
0x1430   :  { %1829 = vrcp.f32 %v1187_v12 }
0x1431   :  { %1831 = vrcp.f32 %v1212_v59 }
0x143a   :  { %v1830_v9 = vpop.eup %1829 }
0x143b   :  { %v1832_v11 = vpop.eup %1831  ;;  %v1191_v17 = vmul.f32 %v1830_v9, %v1068_v44  ;;  %v1342_v44 = vld [vmem:[%s2246_s5 + $0x18] sm:$0xff] }
0x143c   :  { %v1216_v19 = vmul.f32 %v1832_v11, %v1093_v46  ;;  %v1710_v45 = vpack.c.bf16 %v1342_v44, %v1341_v42 }
0x149e   :  { %v1194_v13 = vpop.permute.xlu0 %1193 }
0x149f   :  { %v1196_v14 = vmul.f32 %v1830_v9, %v1194_v13  ;;  %v1219_v15 = vpop.permute.xlu1 %1218 }
0x14a0   :  { %v1221_v16 = vmul.f32 %v1832_v11, %v1219_v15 }
0x14a1   :  { %1198 = vrot.lane.b32.xlu0 %v1196_v14, %s1849_s2 }
0x14a2   :  { %1223 = vrot.lane.b32.xlu1 %v1221_v16, %s1849_s2 }
0x1513   :  { %v1199_v18 = vpop.permute.xlu0 %1198 }
0x1514   :  { %v1201_v20 = vadd.f32 %v1199_v18, %v1191_v17  ;;  %v1224_v21 = vpop.permute.xlu1 %1223 }
0x1515   :  { %v1226_v22 = vadd.f32 %v1224_v21, %v1216_v19 }
0x1516   :  { %1833 = vtanh.f32 %v1201_v20 }
0x1517   :  { %1835 = vtanh.f32 %v1226_v22 }
0x1520   :  { %v1834_v58 = vpop.eup %1833 }
0x1521   :  { %v1836_v23 = vpop.eup %1835  ;;  %1204 = vrot.lane.b32.xlu0 %v1834_v58, %s1848_s24 }
0x1522   :  { %1229 = vrot.lane.b32.xlu1 %v1836_v23, %s1848_s24 }
0x1593   :  { %v1205_v24 = vpop.permute.xlu0 %1204 }
0x1594   :  { %v1207_v25 = vmul.f32 %v1830_v9, %v1205_v24  ;;  %v1230_v26 = vpop.permute.xlu1 %1229 }
0x1595   :  { %v1232_v31 = vmul.f32 %v1832_v11, %v1230_v26 }
0x1596   :  { %1234 = vrot.lane.b32.xlu0 %v1207_v25, %s1849_s2 }
0x1597   :  { %1238 = vrot.lane.b32.xlu1 %v1232_v31, %s1848_s24 }
0x1608   :  { %v1235_v28 = vpop.permute.xlu0 %1234 }
0x1609   :  { %v1239_v29 = vpop.permute.xlu1 %1238 }
0x160a   :  { %v1241_v30 = vsel %vm200_vm3, %v1235_v28, %v1239_v29 }
0x160b   :  { %1563 = vmatmul.mubr.msk.f32.vlgmr.msra.gmra.mrb[8].mxu1 %vm303_vm4, %v1241_v30 }
0x16de   :  { %v1311_v35 = vpop.f32.mrb[8].mxu1 }
0x16df   :  { %v1312_v41 = vadd.f32 %v2071_v1, %v1311_v35  ;;  %v1564_v32 = vpop.f32.mrb[9].mxu1  ;;  %v1339_v1 = vld [vmem:[%s2246_s5] sm:$0xff] }
0x16e0   :  { %v1707_v43 = vpack.c.bf16 %v1340_v40, %v1339_v1 }
0x16e1   :  { %1837 = vtanh.f32 %v1312_v41  ;;  %v1488_v33 = vmul.f32 -1.442695, %v1312_v41 }
0x16e2   :  { %1708 = vmatpush3.bf16.msra.mxu0 %v1707_v43 }
0x16e3   :  { %1839 = vpow2.f32 %v1488_v33  ;;  %1709 = vmatprep.subr.bf16.mxu0 %v1845_v0  ;;  %v1489_v0 = vld [vmem:[%s2248_s6] ss:$0 sm:$0xff] }
0x16e6   :  { %1711 = vmatpush3.bf16.msra.mxu0 %v1710_v45 }
0x16eb   :  { %v1838_v48 = vpop.eup %1837 }
0x16ec   :  { %1324 = vrot.lane.b32.xlu0 %v1838_v48, %s1848_s24 }
0x16ed   :  { %v1840_v60 = vpop.eup %1839 }
0x16ee   :  { %v1318_v34 = vadd.f32 1.0, %v1840_v60 }
0x16f0   :  { %1841 = vrcp.f32 %v1318_v34 }
0x16fa   :  { %v1842_v36 = vpop.eup %1841 }
0x16fb   :  { %v1322_v27 = vmul.f32 %v1842_v36, %v1226_v22 }
0x175e   :  { %v1325_v37 = vpop.permute.xlu0 %1324 }
0x175f   :  { %v1327_v38 = vmul.f32 %v1842_v36, %v1325_v37 }
0x1761   :  { %1329 = vrot.lane.b32.xlu1 %v1327_v38, %s1849_s2 }
0x17d3   :  { %v1330_v55 = vpop.permute.xlu1 %1329 }
0x17d4   :  { %v1332_v39 = vadd.f32 %v1330_v55, %v1322_v27 }
0x17d6   :  { %1843 = vtanh.f32 %v1332_v39 }
0x17e0   :  { %v1844_v46 = vpop.eup %1843 }
0x17e1   :  { %1335 = vrot.lane.b32.xlu0 %v1844_v46, %s1848_s24 }
0x1853   :  { %v1336_v49 = vpop.permute.xlu0 %1335 }
0x1854   :  { %v1338_v4 = vmul.f32 %v1842_v36, %v1336_v49 }
0x1856   :  { %1351 = vrot.lane.b32.xlu1 %v1338_v4, %s1849_s2 }
0x18c8   :  { %v1352_v50 = vpop.permute.xlu1 %1351 }
0x18c9   :  { %1574 = vmatmul.mubr.msk.f32.vlgmr.msra.gmra.mrb[16].mxu0 %vm200_vm3, %v1352_v50 }
0x199c   :  { %v1421_v53 = vpop.f32.mrb[16].mxu0 }
0x199d   :  { %v1422_v10 = vadd.f32 %v1489_v0, %v1421_v53  ;;  %v1575_v54 = vpop.f32.mrb[17].mxu0 }
0x199f   :  { %vm1425_vm5 = vcmp.gt.f32.partialorder %v1422_v10, 0.0  ;;  %v1426_v47 = vmul.f32 0.01, %v1422_v10 }
0x19a1   :  { %v1427_v61 = vsel %vm1425_vm5, %v1422_v10, %v1426_v47 }
0x19a2   :  { %v1435_v56 = vmul.f32 %v1491_v52, %v1427_v61 }
0x19a4   :  { %v1437_v57 = vsel %vm1436_vm6, %v1435_v56, 0.0 }
0x19a5   :  { %1438 = vadd.xlane.f32.xlu0 %v1437_v57 }
0x1a32   :  { %v1439_v63 = vpop.xlane.xlu0 %1438 }
0x1a33   :  { %v1447_v2 = vadd.f32 %v1492_v62, %v1439_v63 }
0x1a35   :  { %1449 = vst.msk [vmem:[%s2250_s9] sm:$0xff] %vm1448_vm7, %v1447_v2 }

</bundles_post_ra>
